<compile_context>
chip_gen: v5e
topology: v5e:2x2
jax: 0.10.0
libtpu: 0.0.40
codegen_flags: <defaults>
</compile_context>

<pallas_src>
import numpy as np
import jax
import jax.numpy as jnp
from jax import lax
from jax.experimental import pallas as pl
from jax.experimental.pallas import tpu as pltpu

MARGIN = 1.0


# ----------------------------------------------------------------------------
# Pallas kernel
# ----------------------------------------------------------------------------
def _make_kernel(L, B, SB, LP, margin):
    """L: sentence length, B: batch, SB: sublane (2B padded to 8), LP: lane (L padded to 128)."""
    B2 = 2 * B  # gold lanes [0:B] | max lanes [B:2B] packed on the sublane axis

    def kernel(scal_ref, constr_ref, out_ref, chart_ref):
        # scal_ref   : (L, L, SB, LP) f32  [level, split idx, batch-lane (gold|max|pad), pos]
        #              invalid (idx, pos) slots are packed as 0.0 on the host (finite).
        # constr_ref : (L, SB, LP)    i32  forced split idx per cell, or -1 if unconstrained
        # out_ref    : (SB, LP)       f32  root chart row; loss additionally stashed at [0, 1]
        # chart_ref  : (L, SB, LP)    f32  persistent DP chart [level, batch-lane, pos]

        # Leaves. Rows 1..L-1 are always fully written (all LP lanes) before being read,
        # so no other initialization is required (and stale VMEM never leaks in).
        chart_ref[0] = jnp.ones((SB, LP), jnp.float32)

        for level in range(1, L):                 # static unroll: L is small here
            constr = constr_ref[level]            # (SB, LP) i32
            best = None
            forced_val = None
            for idx in range(level):              # exactly `level` valid splits, no masking
                left = chart_ref[idx]                            # (SB, LP)
                right_row = chart_ref[level - idx - 1]           # (SB, LP)
                # right[., pos] = chart[level-idx-1][., pos + idx + 1]
                # (lane rotation on the XLU; wrapped lanes land in padding positions only)
                right = pltpu.roll(right_row, shift=(LP - (idx + 1)) % LP, axis=1)
                val = left + right + scal_ref[level, idx]        # (SB, LP)
                if idx == 0:
                    best = val
                    forced_val = val              # default forced split is idx 0
                else:
                    best = jnp.maximum(best, val)
                    forced_val = jnp.where(constr == idx, val, forced_val)
            # constrained cells take the forced split's value, others the CKY max.
            chart_ref[level] = jnp.where(constr >= 0, forced_val, best)

        # ---- epilogue: root scores + loss -----------------------------------
        root = chart_ref[L - 1]                   # (SB, LP); valid scores at pos 0 only
        out_ref[...] = root

        # loss = sum_b (max_b - gold_b + margin) / B, via full-tile masked sums
        # (gold scores at rows 0:B, max scores at rows B:2B, column 0).
        row = lax.broadcasted_iota(jnp.int32, (SB, LP), 0)
        col = lax.broadcasted_iota(jnp.int32, (SB, LP), 1)
        gold_mask = (row < B) & (col == 0)
        max_mask = (row >= B) & (row < B2) & (col == 0)
        signed = jnp.where(max_mask, root, 0.0) - jnp.where(gold_mask, root, 0.0)
        loss = jnp.sum(signed, axis=(0, 1), keepdims=True) / float(B) + float(margin)
        out_ref[0:1, 1:2] = loss                  # pos 1 of the root row is padding

    return kernel


def semi_supervised_parsing_loss_pallas(scal_dense, constr, L, B, SB, LP,
                                         margin=MARGIN):
    """scal_dense: (L, L, SB, LP) f32  [level, idx, gold|max|pad batch-lane, pos]
       constr    : (L, SB, LP)    i32  forced split idx or -1."""
    kernel = _make_kernel(L, B, SB, LP, margin)

    # Everything is resident (no pipelining): scal + constr + chart + out.
    need = 4 * (L * L * SB * LP + 2 * L * SB * LP + SB * LP)
    # Keep headroom even on v7x's 64 MiB VMEM.
    vmem_limit = int(min(max(2 * need, 16 << 20), 48 << 20))

    out = pl.pallas_call(
        kernel,
        out_shape=jax.ShapeDtypeStruct((SB, LP), jnp.float32),
        in_specs=[
            pl.BlockSpec(memory_space=pltpu.MemorySpace.VMEM),
            pl.BlockSpec(memory_space=pltpu.MemorySpace.VMEM),
        ],
        out_specs=pl.BlockSpec(memory_space=pltpu.MemorySpace.VMEM),
        scratch_shapes=[pltpu.VMEM((L, SB, LP), jnp.float32)],
        compiler_params=pltpu.CompilerParams(vmem_limit_bytes=vmem_limit),
    )(scal_dense, constr)

    gold_scores = out[0:B, 0]
    max_scores = out[B:2 * B, 0]
    loss = out[0:1, 1]            # shape (1,), mirrors torch .view(1)
    return loss, gold_scores, max_scores


# ----------------------------------------------------------------------------
# Host-side glue (ports of the module's pure-Python span logic)
# ----------------------------------------------------------------------------
def make_right_tree(spans):
    result = []
    for s in spans:
        tmp = []
        for t in s:
            start = int(t[0])
            l = int(t[1])
            end = start + l - 1
            for i in range(1, l):
                tmp.append((end - i, i + 1))
        result.append(tmp[:])
    return result


def build_constraints(spans, L, B):
    """Dense to_choose / to_choose_assert tables for every chart cell: (L, L, B)."""
    forced = np.zeros((L, L, B), np.int32)
    flags = np.zeros((L, L, B), np.int32)
    span_sets = [set(tuple(map(int, sp)) for sp in s) for s in spans]
    for level in range(1, L):
        for pos in range(L - level):
            for b in range(B):
                for idx in range(level):
                    l_size, r_size = idx + 1, level - idx
                    l_span, r_span = (pos, l_size), (pos + idx + 1, r_size)
                    left_in = l_size == 1 or l_span in span_sets[b]
                    right_in = r_size == 1 or r_span in span_sets[b]
                    if left_in and right_in:
                        assert flags[level, pos, b] == 0, 'Only one valid tree.'
                        forced[level, pos, b] = idx
                        flags[level, pos, b] = 1
    return forced, flags


def cky_parse_spans(scalars_np, L, B):
    """Host-side stand-in for CKY(net=diora).parse_batch + tree_to_spans:
    max-scoring tree under the same additive chart recursion."""
    chart = np.ones((L, L, B), np.float32)
    bp = np.zeros((L, L, B), np.int32)
    for level in range(1, L):
        for pos in range(L - level):
            ps = np.stack(
                [chart[idx, pos] + chart[level - idx - 1, pos + idx + 1]
                 + scalars_np[level][pos][:, idx] for idx in range(level)], axis=1)
            best = ps.argmax(1)
            chart[level, pos] = ps[np.arange(B), best]
            bp[level, pos] = best
    spans = []
    for b in range(B):
        out = []

        def rec(level, pos):
            if level == 0:
                return
            out.append((pos, level + 1))
            k = int(bp[level, pos, b])
            rec(k, pos)
            rec(level - k - 1, pos + k + 1)

        rec(L - 1, 0)
        spans.append(out)
    return spans


def get_score_for_spans_ref(scalars_np, spans, L, B):
    """Numpy reference port of the torch get_score_for_spans."""
    span_sets = [set(tuple(map(int, sp)) for sp in s) for s in spans]
    chart = np.ones((L, L, B), np.float32)
    for level in range(1, L):
        for pos in range(L - level):
            to_choose = [0] * B
            to_assert = [False] * B
            ps = np.stack(
                [chart[idx, pos] + chart[level - idx - 1, pos + idx + 1]
                 + scalars_np[level][pos][:, idx] for idx in range(level)], axis=1)
            for idx in range(level):
                l_size, r_size = idx + 1, level - idx
                l_span, r_span = (pos, l_size), (pos + idx + 1, r_size)
                for b in range(B):
                    if (l_size == 1 or l_span in span_sets[b]) and \
                       (r_size == 1 or r_span in span_sets[b]):
                        to_choose[b] = idx
                        to_assert[b] = True
            argmax1 = ps.argmax(1) * np.array([not a for a in to_assert], np.int64)
            argmax2 = argmax1 + np.array(to_choose, np.int64)
            chart[level, pos] = ps[np.arange(B), argmax2]
    return chart[L - 1, 0]


def pack_inputs(scalars_np, gold_forced, gold_flag, max_forced, max_flag,
                L, B, SB, LP):
    """Pack scalars/constraints into the lane-dense kernel layout:
       scal  : (L, L, SB, LP) f32  [level, idx, batch-lane, pos] (invalid slots = 0)
       constr: (L, SB, LP)    i32  forced split idx or -1."""
    B2 = 2 * B
    scal = np.zeros((L, L, SB, LP), np.float32)
    constr = np.full((L, SB, LP), -1, np.int32)
    for level in range(1, L):
        for pos in range(L - level):
            v = scalars_np[level][pos]            # (B, level)
            scal[level, :level, 0:B, pos] = v.T
            scal[level, :level, B:B2, pos] = v.T
            for b in range(B):
                if gold_flag[level, pos, b]:
                    constr[level, b, pos] = gold_forced[level, pos, b]
                if max_flag[level, pos, b]:
                    constr[level, B + b, pos] = max_forced[level, pos, b]
    return scal, constr


# ----------------------------------------------------------------------------
if __name__ == "__main__":
    B, L = 2, 8                                   # batch_size, sentence length
    B2 = 2 * B
    SB = max(8, -(-B2 // 8) * 8)                  # sublane (batch-lane) axis, padded to 8
    LP = max(128, -(-L // 128) * 128)             # lane (position) axis, padded to 128

    key = jax.random.PRNGKey(0)
    k_sent, k_scal = jax.random.split(key)
    sentences = jax.random.randint(k_sent, (B, L), 0, 100, dtype=jnp.int32)

    # diora.saved_scalars[level][pos] : (B, level) split scores (synthetic, deterministic)
    scalars_np = {}
    kk = k_scal
    for level in range(1, L):
        scalars_np[level] = {}
        for pos in range(L - level):
            kk, sub = jax.random.split(kk)
            scalars_np[level][pos] = np.asarray(
                jax.random.normal(sub, (B, level), jnp.float32))

    # info['spans'] : gold (start, length) spans per sentence
    info_spans = [
        [(1, 3)],
        [(0, 2), (4, 3)],
    ]

    # --- glue: span bookkeeping ------------------------------------------------
    gold_spans_r = make_right_tree(info_spans)
    gold_forced, gold_flag = build_constraints(gold_spans_r, L, B)

    # TODO(synk): CKY parse_predictor / tree_to_spans are external classes;
    # max-tree spans are produced by an equivalent host-side CKY over the same scalars.
    max_spans = cky_parse_spans(scalars_np, L, B)
    max_forced, max_flag = build_constraints(max_spans, L, B)

    scal_dense, constr = pack_inputs(scalars_np, gold_forced, gold_flag,
                                     max_forced, max_flag, L, B, SB, LP)

    # --- Pallas kernel ---------------------------------------------------------
    loss, gold_scores, max_scores = semi_supervised_parsing_loss_pallas(
        jnp.asarray(scal_dense), jnp.asarray(constr), L, B, SB, LP, margin=MARGIN)
    jax.block_until_ready(loss)

    # --- numpy reference check -------------------------------------------------
    gold_ref = get_score_for_spans_ref(scalars_np, gold_spans_r, L, B)
    max_ref = get_score_for_spans_ref(scalars_np, max_spans, L, B)
    loss_ref = np.sum(max_ref - gold_ref + MARGIN) / B

    np.testing.assert_allclose(np.asarray(gold_scores), gold_ref, rtol=1e-5, atol=1e-5)
    np.testing.assert_allclose(np.asarray(max_scores), max_ref, rtol=1e-5, atol=1e-5)
    np.testing.assert_allclose(np.asarray(loss), [loss_ref], rtol=1e-5, atol=1e-5)

    print("KERNEL_OK")
</pallas_src>

<mosaic_0001>
module attributes {stable_mosaic.version = 11 : i64} {
  func.func @kernel(%arg0: memref<8x8x8x128xf32, #tpu.memory_space<vmem>>, %arg1: memref<8x8x128xi32, #tpu.memory_space<vmem>>, %arg2: memref<8x128xf32, #tpu.memory_space<vmem>>, %arg3: memref<8x8x128xf32, #tpu.memory_space<vmem>>) attributes {dimension_semantics = [], scalar_prefetch = 0 : i64, scratch_operands = 1 : i64, tpu.core_type = #tpu.core_type<tc>} {
    %cst = arith.constant 1.000000e+00 : f32
    %0 = vector.broadcast %cst : f32 to vector<8x128xf32>
    %c0 = arith.constant 0 : index
    %c0_0 = arith.constant 0 : index
    %c0_1 = arith.constant 0 : index
    %1 = vector.load %arg3[%c0, %c0_0, %c0_1] : memref<8x8x128xf32, #tpu.memory_space<vmem>>, vector<1x8x128xf32>
    %2 = vector.shape_cast %1 : vector<1x8x128xf32> to vector<8x128xf32>
    %3 = vector.shape_cast %0 : vector<8x128xf32> to vector<1x8x128xf32>
    tpu.vector_store %arg3[%c0, %c0_0, %c0_1], %3 {strides = array<i32>} : memref<8x8x128xf32, #tpu.memory_space<vmem>>, vector<1x8x128xf32>,
    %c1 = arith.constant 1 : index
    %c0_2 = arith.constant 0 : index
    %c0_3 = arith.constant 0 : index
    %4 = vector.load %arg1[%c1, %c0_2, %c0_3] : memref<8x8x128xi32, #tpu.memory_space<vmem>>, vector<1x8x128xi32>
    %5 = vector.shape_cast %4 : vector<1x8x128xi32> to vector<8x128xi32>
    %c0_4 = arith.constant 0 : index
    %c0_5 = arith.constant 0 : index
    %c0_6 = arith.constant 0 : index
    %6 = vector.load %arg3[%c0_4, %c0_5, %c0_6] : memref<8x8x128xf32, #tpu.memory_space<vmem>>, vector<1x8x128xf32>
    %7 = vector.shape_cast %6 : vector<1x8x128xf32> to vector<8x128xf32>
    %c0_7 = arith.constant 0 : index
    %c0_8 = arith.constant 0 : index
    %c0_9 = arith.constant 0 : index
    %8 = vector.load %arg3[%c0_7, %c0_8, %c0_9] : memref<8x8x128xf32, #tpu.memory_space<vmem>>, vector<1x8x128xf32>
    %9 = vector.shape_cast %8 : vector<1x8x128xf32> to vector<8x128xf32>
    %c127_i32 = arith.constant 127 : i32
    %10 = tpu.dynamic_rotate %9 by %c127_i32 dim 1 : vector<8x128xf32>, i32 -> vector<8x128xf32>
    %11 = arith.addf %7, %10 : vector<8x128xf32>
    %c1_10 = arith.constant 1 : index
    %c0_11 = arith.constant 0 : index
    %c0_12 = arith.constant 0 : index
    %c0_13 = arith.constant 0 : index
    %12 = vector.load %arg0[%c1_10, %c0_11, %c0_12, %c0_13] : memref<8x8x8x128xf32, #tpu.memory_space<vmem>>, vector<1x1x8x128xf32>
    %13 = vector.shape_cast %12 : vector<1x1x8x128xf32> to vector<8x128xf32>
    %14 = arith.addf %11, %13 : vector<8x128xf32>
    %c0_i32 = arith.constant 0 : i32
    %15 = vector.broadcast %c0_i32 : i32 to vector<8x128xi32>
    %16 = arith.cmpi sge, %5, %15 : vector<8x128xi32>
    %17 = arith.select %16, %14, %14 : vector<8x128xi1>, vector<8x128xf32>
    %c1_14 = arith.constant 1 : index
    %c0_15 = arith.constant 0 : index
    %c0_16 = arith.constant 0 : index
    %18 = vector.load %arg3[%c1_14, %c0_15, %c0_16] : memref<8x8x128xf32, #tpu.memory_space<vmem>>, vector<1x8x128xf32>
    %19 = vector.shape_cast %18 : vector<1x8x128xf32> to vector<8x128xf32>
    %20 = vector.shape_cast %17 : vector<8x128xf32> to vector<1x8x128xf32>
    tpu.vector_store %arg3[%c1_14, %c0_15, %c0_16], %20 {strides = array<i32>} : memref<8x8x128xf32, #tpu.memory_space<vmem>>, vector<1x8x128xf32>,
    %c2 = arith.constant 2 : index
    %c0_17 = arith.constant 0 : index
    %c0_18 = arith.constant 0 : index
    %21 = vector.load %arg1[%c2, %c0_17, %c0_18] : memref<8x8x128xi32, #tpu.memory_space<vmem>>, vector<1x8x128xi32>
    %22 = vector.shape_cast %21 : vector<1x8x128xi32> to vector<8x128xi32>
    %c0_19 = arith.constant 0 : index
    %c0_20 = arith.constant 0 : index
    %c0_21 = arith.constant 0 : index
    %23 = vector.load %arg3[%c0_19, %c0_20, %c0_21] : memref<8x8x128xf32, #tpu.memory_space<vmem>>, vector<1x8x128xf32>
    %24 = vector.shape_cast %23 : vector<1x8x128xf32> to vector<8x128xf32>
    %c1_22 = arith.constant 1 : index
    %c0_23 = arith.constant 0 : index
    %c0_24 = arith.constant 0 : index
    %25 = vector.load %arg3[%c1_22, %c0_23, %c0_24] : memref<8x8x128xf32, #tpu.memory_space<vmem>>, vector<1x8x128xf32>
    %26 = vector.shape_cast %25 : vector<1x8x128xf32> to vector<8x128xf32>
    %c127_i32_25 = arith.constant 127 : i32
    %27 = tpu.dynamic_rotate %26 by %c127_i32_25 dim 1 : vector<8x128xf32>, i32 -> vector<8x128xf32>
    %28 = arith.addf %24, %27 : vector<8x128xf32>
    %c2_26 = arith.constant 2 : index
    %c0_27 = arith.constant 0 : index
    %c0_28 = arith.constant 0 : index
    %c0_29 = arith.constant 0 : index
    %29 = vector.load %arg0[%c2_26, %c0_27, %c0_28, %c0_29] : memref<8x8x8x128xf32, #tpu.memory_space<vmem>>, vector<1x1x8x128xf32>
    %30 = vector.shape_cast %29 : vector<1x1x8x128xf32> to vector<8x128xf32>
    %31 = arith.addf %28, %30 : vector<8x128xf32>
    %c1_30 = arith.constant 1 : index
    %c0_31 = arith.constant 0 : index
    %c0_32 = arith.constant 0 : index
    %32 = vector.load %arg3[%c1_30, %c0_31, %c0_32] : memref<8x8x128xf32, #tpu.memory_space<vmem>>, vector<1x8x128xf32>
    %33 = vector.shape_cast %32 : vector<1x8x128xf32> to vector<8x128xf32>
    %c0_33 = arith.constant 0 : index
    %c0_34 = arith.constant 0 : index
    %c0_35 = arith.constant 0 : index
    %34 = vector.load %arg3[%c0_33, %c0_34, %c0_35] : memref<8x8x128xf32, #tpu.memory_space<vmem>>, vector<1x8x128xf32>
    %35 = vector.shape_cast %34 : vector<1x8x128xf32> to vector<8x128xf32>
    %c126_i32 = arith.constant 126 : i32
    %36 = tpu.dynamic_rotate %35 by %c126_i32 dim 1 : vector<8x128xf32>, i32 -> vector<8x128xf32>
    %37 = arith.addf %33, %36 : vector<8x128xf32>
    %c2_36 = arith.constant 2 : index
    %c1_37 = arith.constant 1 : index
    %c0_38 = arith.constant 0 : index
    %c0_39 = arith.constant 0 : index
    %38 = vector.load %arg0[%c2_36, %c1_37, %c0_38, %c0_39] : memref<8x8x8x128xf32, #tpu.memory_space<vmem>>, vector<1x1x8x128xf32>
    %39 = vector.shape_cast %38 : vector<1x1x8x128xf32> to vector<8x128xf32>
    %40 = arith.addf %37, %39 : vector<8x128xf32>
    %41 = arith.maximumf %31, %40 : vector<8x128xf32>
    %c1_i32 = arith.constant 1 : i32
    %42 = vector.broadcast %c1_i32 : i32 to vector<8x128xi32>
    %43 = arith.cmpi eq, %22, %42 : vector<8x128xi32>
    %44 = arith.select %43, %40, %31 : vector<8x128xi1>, vector<8x128xf32>
    %c0_i32_40 = arith.constant 0 : i32
    %45 = vector.broadcast %c0_i32_40 : i32 to vector<8x128xi32>
    %46 = arith.cmpi sge, %22, %45 : vector<8x128xi32>
    %47 = arith.select %46, %44, %41 : vector<8x128xi1>, vector<8x128xf32>
    %c2_41 = arith.constant 2 : index
    %c0_42 = arith.constant 0 : index
    %c0_43 = arith.constant 0 : index
    %48 = vector.load %arg3[%c2_41, %c0_42, %c0_43] : memref<8x8x128xf32, #tpu.memory_space<vmem>>, vector<1x8x128xf32>
    %49 = vector.shape_cast %48 : vector<1x8x128xf32> to vector<8x128xf32>
    %50 = vector.shape_cast %47 : vector<8x128xf32> to vector<1x8x128xf32>
    tpu.vector_store %arg3[%c2_41, %c0_42, %c0_43], %50 {strides = array<i32>} : memref<8x8x128xf32, #tpu.memory_space<vmem>>, vector<1x8x128xf32>,
    %c3 = arith.constant 3 : index
    %c0_44 = arith.constant 0 : index
    %c0_45 = arith.constant 0 : index
    %51 = vector.load %arg1[%c3, %c0_44, %c0_45] : memref<8x8x128xi32, #tpu.memory_space<vmem>>, vector<1x8x128xi32>
    %52 = vector.shape_cast %51 : vector<1x8x128xi32> to vector<8x128xi32>
    %c0_46 = arith.constant 0 : index
    %c0_47 = arith.constant 0 : index
    %c0_48 = arith.constant 0 : index
    %53 = vector.load %arg3[%c0_46, %c0_47, %c0_48] : memref<8x8x128xf32, #tpu.memory_space<vmem>>, vector<1x8x128xf32>
    %54 = vector.shape_cast %53 : vector<1x8x128xf32> to vector<8x128xf32>
    %c2_49 = arith.constant 2 : index
    %c0_50 = arith.constant 0 : index
    %c0_51 = arith.constant 0 : index
    %55 = vector.load %arg3[%c2_49, %c0_50, %c0_51] : memref<8x8x128xf32, #tpu.memory_space<vmem>>, vector<1x8x128xf32>
    %56 = vector.shape_cast %55 : vector<1x8x128xf32> to vector<8x128xf32>
    %c127_i32_52 = arith.constant 127 : i32
    %57 = tpu.dynamic_rotate %56 by %c127_i32_52 dim 1 : vector<8x128xf32>, i32 -> vector<8x128xf32>
    %58 = arith.addf %54, %57 : vector<8x128xf32>
    %c3_53 = arith.constant 3 : index
    %c0_54 = arith.constant 0 : index
    %c0_55 = arith.constant 0 : index
    %c0_56 = arith.constant 0 : index
    %59 = vector.load %arg0[%c3_53, %c0_54, %c0_55, %c0_56] : memref<8x8x8x128xf32, #tpu.memory_space<vmem>>, vector<1x1x8x128xf32>
    %60 = vector.shape_cast %59 : vector<1x1x8x128xf32> to vector<8x128xf32>
    %61 = arith.addf %58, %60 : vector<8x128xf32>
    %c1_57 = arith.constant 1 : index
    %c0_58 = arith.constant 0 : index
    %c0_59 = arith.constant 0 : index
    %62 = vector.load %arg3[%c1_57, %c0_58, %c0_59] : memref<8x8x128xf32, #tpu.memory_space<vmem>>, vector<1x8x128xf32>
    %63 = vector.shape_cast %62 : vector<1x8x128xf32> to vector<8x128xf32>
    %c1_60 = arith.constant 1 : index
    %c0_61 = arith.constant 0 : index
    %c0_62 = arith.constant 0 : index
    %64 = vector.load %arg3[%c1_60, %c0_61, %c0_62] : memref<8x8x128xf32, #tpu.memory_space<vmem>>, vector<1x8x128xf32>
    %65 = vector.shape_cast %64 : vector<1x8x128xf32> to vector<8x128xf32>
    %c126_i32_63 = arith.constant 126 : i32
    %66 = tpu.dynamic_rotate %65 by %c126_i32_63 dim 1 : vector<8x128xf32>, i32 -> vector<8x128xf32>
    %67 = arith.addf %63, %66 : vector<8x128xf32>
    %c3_64 = arith.constant 3 : index
    %c1_65 = arith.constant 1 : index
    %c0_66 = arith.constant 0 : index
    %c0_67 = arith.constant 0 : index
    %68 = vector.load %arg0[%c3_64, %c1_65, %c0_66, %c0_67] : memref<8x8x8x128xf32, #tpu.memory_space<vmem>>, vector<1x1x8x128xf32>
    %69 = vector.shape_cast %68 : vector<1x1x8x128xf32> to vector<8x128xf32>
    %70 = arith.addf %67, %69 : vector<8x128xf32>
    %71 = arith.maximumf %61, %70 : vector<8x128xf32>
    %c1_i32_68 = arith.constant 1 : i32
    %72 = vector.broadcast %c1_i32_68 : i32 to vector<8x128xi32>
    %73 = arith.cmpi eq, %52, %72 : vector<8x128xi32>
    %74 = arith.select %73, %70, %61 : vector<8x128xi1>, vector<8x128xf32>
    %c2_69 = arith.constant 2 : index
    %c0_70 = arith.constant 0 : index
    %c0_71 = arith.constant 0 : index
    %75 = vector.load %arg3[%c2_69, %c0_70, %c0_71] : memref<8x8x128xf32, #tpu.memory_space<vmem>>, vector<1x8x128xf32>
    %76 = vector.shape_cast %75 : vector<1x8x128xf32> to vector<8x128xf32>
    %c0_72 = arith.constant 0 : index
    %c0_73 = arith.constant 0 : index
    %c0_74 = arith.constant 0 : index
    %77 = vector.load %arg3[%c0_72, %c0_73, %c0_74] : memref<8x8x128xf32, #tpu.memory_space<vmem>>, vector<1x8x128xf32>
    %78 = vector.shape_cast %77 : vector<1x8x128xf32> to vector<8x128xf32>
    %c125_i32 = arith.constant 125 : i32
    %79 = tpu.dynamic_rotate %78 by %c125_i32 dim 1 : vector<8x128xf32>, i32 -> vector<8x128xf32>
    %80 = arith.addf %76, %79 : vector<8x128xf32>
    %c3_75 = arith.constant 3 : index
    %c2_76 = arith.constant 2 : index
    %c0_77 = arith.constant 0 : index
    %c0_78 = arith.constant 0 : index
    %81 = vector.load %arg0[%c3_75, %c2_76, %c0_77, %c0_78] : memref<8x8x8x128xf32, #tpu.memory_space<vmem>>, vector<1x1x8x128xf32>
    %82 = vector.shape_cast %81 : vector<1x1x8x128xf32> to vector<8x128xf32>
    %83 = arith.addf %80, %82 : vector<8x128xf32>
    %84 = arith.maximumf %71, %83 : vector<8x128xf32>
    %c2_i32 = arith.constant 2 : i32
    %85 = vector.broadcast %c2_i32 : i32 to vector<8x128xi32>
    %86 = arith.cmpi eq, %52, %85 : vector<8x128xi32>
    %87 = arith.select %86, %83, %74 : vector<8x128xi1>, vector<8x128xf32>
    %c0_i32_79 = arith.constant 0 : i32
    %88 = vector.broadcast %c0_i32_79 : i32 to vector<8x128xi32>
    %89 = arith.cmpi sge, %52, %88 : vector<8x128xi32>
    %90 = arith.select %89, %87, %84 : vector<8x128xi1>, vector<8x128xf32>
    %c3_80 = arith.constant 3 : index
    %c0_81 = arith.constant 0 : index
    %c0_82 = arith.constant 0 : index
    %91 = vector.load %arg3[%c3_80, %c0_81, %c0_82] : memref<8x8x128xf32, #tpu.memory_space<vmem>>, vector<1x8x128xf32>
    %92 = vector.shape_cast %91 : vector<1x8x128xf32> to vector<8x128xf32>
    %93 = vector.shape_cast %90 : vector<8x128xf32> to vector<1x8x128xf32>
    tpu.vector_store %arg3[%c3_80, %c0_81, %c0_82], %93 {strides = array<i32>} : memref<8x8x128xf32, #tpu.memory_space<vmem>>, vector<1x8x128xf32>,
    %c4 = arith.constant 4 : index
    %c0_83 = arith.constant 0 : index
    %c0_84 = arith.constant 0 : index
    %94 = vector.load %arg1[%c4, %c0_83, %c0_84] : memref<8x8x128xi32, #tpu.memory_space<vmem>>, vector<1x8x128xi32>
    %95 = vector.shape_cast %94 : vector<1x8x128xi32> to vector<8x128xi32>
    %c0_85 = arith.constant 0 : index
    %c0_86 = arith.constant 0 : index
    %c0_87 = arith.constant 0 : index
    %96 = vector.load %arg3[%c0_85, %c0_86, %c0_87] : memref<8x8x128xf32, #tpu.memory_space<vmem>>, vector<1x8x128xf32>
    %97 = vector.shape_cast %96 : vector<1x8x128xf32> to vector<8x128xf32>
    %c3_88 = arith.constant 3 : index
    %c0_89 = arith.constant 0 : index
    %c0_90 = arith.constant 0 : index
    %98 = vector.load %arg3[%c3_88, %c0_89, %c0_90] : memref<8x8x128xf32, #tpu.memory_space<vmem>>, vector<1x8x128xf32>
    %99 = vector.shape_cast %98 : vector<1x8x128xf32> to vector<8x128xf32>
    %c127_i32_91 = arith.constant 127 : i32
    %100 = tpu.dynamic_rotate %99 by %c127_i32_91 dim 1 : vector<8x128xf32>, i32 -> vector<8x128xf32>
    %101 = arith.addf %97, %100 : vector<8x128xf32>
    %c4_92 = arith.constant 4 : index
    %c0_93 = arith.constant 0 : index
    %c0_94 = arith.constant 0 : index
    %c0_95 = arith.constant 0 : index
    %102 = vector.load %arg0[%c4_92, %c0_93, %c0_94, %c0_95] : memref<8x8x8x128xf32, #tpu.memory_space<vmem>>, vector<1x1x8x128xf32>
    %103 = vector.shape_cast %102 : vector<1x1x8x128xf32> to vector<8x128xf32>
    %104 = arith.addf %101, %103 : vector<8x128xf32>
    %c1_96 = arith.constant 1 : index
    %c0_97 = arith.constant 0 : index
    %c0_98 = arith.constant 0 : index
    %105 = vector.load %arg3[%c1_96, %c0_97, %c0_98] : memref<8x8x128xf32, #tpu.memory_space<vmem>>, vector<1x8x128xf32>
    %106 = vector.shape_cast %105 : vector<1x8x128xf32> to vector<8x128xf32>
    %c2_99 = arith.constant 2 : index
    %c0_100 = arith.constant 0 : index
    %c0_101 = arith.constant 0 : index
    %107 = vector.load %arg3[%c2_99, %c0_100, %c0_101] : memref<8x8x128xf32, #tpu.memory_space<vmem>>, vector<1x8x128xf32>
    %108 = vector.shape_cast %107 : vector<1x8x128xf32> to vector<8x128xf32>
    %c126_i32_102 = arith.constant 126 : i32
    %109 = tpu.dynamic_rotate %108 by %c126_i32_102 dim 1 : vector<8x128xf32>, i32 -> vector<8x128xf32>
    %110 = arith.addf %106, %109 : vector<8x128xf32>
    %c4_103 = arith.constant 4 : index
    %c1_104 = arith.constant 1 : index
    %c0_105 = arith.constant 0 : index
    %c0_106 = arith.constant 0 : index
    %111 = vector.load %arg0[%c4_103, %c1_104, %c0_105, %c0_106] : memref<8x8x8x128xf32, #tpu.memory_space<vmem>>, vector<1x1x8x128xf32>
    %112 = vector.shape_cast %111 : vector<1x1x8x128xf32> to vector<8x128xf32>
    %113 = arith.addf %110, %112 : vector<8x128xf32>
    %114 = arith.maximumf %104, %113 : vector<8x128xf32>
    %c1_i32_107 = arith.constant 1 : i32
    %115 = vector.broadcast %c1_i32_107 : i32 to vector<8x128xi32>
    %116 = arith.cmpi eq, %95, %115 : vector<8x128xi32>
    %117 = arith.select %116, %113, %104 : vector<8x128xi1>, vector<8x128xf32>
    %c2_108 = arith.constant 2 : index
    %c0_109 = arith.constant 0 : index
    %c0_110 = arith.constant 0 : index
    %118 = vector.load %arg3[%c2_108, %c0_109, %c0_110] : memref<8x8x128xf32, #tpu.memory_space<vmem>>, vector<1x8x128xf32>
    %119 = vector.shape_cast %118 : vector<1x8x128xf32> to vector<8x128xf32>
    %c1_111 = arith.constant 1 : index
    %c0_112 = arith.constant 0 : index
    %c0_113 = arith.constant 0 : index
    %120 = vector.load %arg3[%c1_111, %c0_112, %c0_113] : memref<8x8x128xf32, #tpu.memory_space<vmem>>, vector<1x8x128xf32>
    %121 = vector.shape_cast %120 : vector<1x8x128xf32> to vector<8x128xf32>
    %c125_i32_114 = arith.constant 125 : i32
    %122 = tpu.dynamic_rotate %121 by %c125_i32_114 dim 1 : vector<8x128xf32>, i32 -> vector<8x128xf32>
    %123 = arith.addf %119, %122 : vector<8x128xf32>
    %c4_115 = arith.constant 4 : index
    %c2_116 = arith.constant 2 : index
    %c0_117 = arith.constant 0 : index
    %c0_118 = arith.constant 0 : index
    %124 = vector.load %arg0[%c4_115, %c2_116, %c0_117, %c0_118] : memref<8x8x8x128xf32, #tpu.memory_space<vmem>>, vector<1x1x8x128xf32>
    %125 = vector.shape_cast %124 : vector<1x1x8x128xf32> to vector<8x128xf32>
    %126 = arith.addf %123, %125 : vector<8x128xf32>
    %127 = arith.maximumf %114, %126 : vector<8x128xf32>
    %c2_i32_119 = arith.constant 2 : i32
    %128 = vector.broadcast %c2_i32_119 : i32 to vector<8x128xi32>
    %129 = arith.cmpi eq, %95, %128 : vector<8x128xi32>
    %130 = arith.select %129, %126, %117 : vector<8x128xi1>, vector<8x128xf32>
    %c3_120 = arith.constant 3 : index
    %c0_121 = arith.constant 0 : index
    %c0_122 = arith.constant 0 : index
    %131 = vector.load %arg3[%c3_120, %c0_121, %c0_122] : memref<8x8x128xf32, #tpu.memory_space<vmem>>, vector<1x8x128xf32>
    %132 = vector.shape_cast %131 : vector<1x8x128xf32> to vector<8x128xf32>
    %c0_123 = arith.constant 0 : index
    %c0_124 = arith.constant 0 : index
    %c0_125 = arith.constant 0 : index
    %133 = vector.load %arg3[%c0_123, %c0_124, %c0_125] : memref<8x8x128xf32, #tpu.memory_space<vmem>>, vector<1x8x128xf32>
    %134 = vector.shape_cast %133 : vector<1x8x128xf32> to vector<8x128xf32>
    %c124_i32 = arith.constant 124 : i32
    %135 = tpu.dynamic_rotate %134 by %c124_i32 dim 1 : vector<8x128xf32>, i32 -> vector<8x128xf32>
    %136 = arith.addf %132, %135 : vector<8x128xf32>
    %c4_126 = arith.constant 4 : index
    %c3_127 = arith.constant 3 : index
    %c0_128 = arith.constant 0 : index
    %c0_129 = arith.constant 0 : index
    %137 = vector.load %arg0[%c4_126, %c3_127, %c0_128, %c0_129] : memref<8x8x8x128xf32, #tpu.memory_space<vmem>>, vector<1x1x8x128xf32>
    %138 = vector.shape_cast %137 : vector<1x1x8x128xf32> to vector<8x128xf32>
    %139 = arith.addf %136, %138 : vector<8x128xf32>
    %140 = arith.maximumf %127, %139 : vector<8x128xf32>
    %c3_i32 = arith.constant 3 : i32
    %141 = vector.broadcast %c3_i32 : i32 to vector<8x128xi32>
    %142 = arith.cmpi eq, %95, %141 : vector<8x128xi32>
    %143 = arith.select %142, %139, %130 : vector<8x128xi1>, vector<8x128xf32>
    %c0_i32_130 = arith.constant 0 : i32
    %144 = vector.broadcast %c0_i32_130 : i32 to vector<8x128xi32>
    %145 = arith.cmpi sge, %95, %144 : vector<8x128xi32>
    %146 = arith.select %145, %143, %140 : vector<8x128xi1>, vector<8x128xf32>
    %c4_131 = arith.constant 4 : index
    %c0_132 = arith.constant 0 : index
    %c0_133 = arith.constant 0 : index
    %147 = vector.load %arg3[%c4_131, %c0_132, %c0_133] : memref<8x8x128xf32, #tpu.memory_space<vmem>>, vector<1x8x128xf32>
    %148 = vector.shape_cast %147 : vector<1x8x128xf32> to vector<8x128xf32>
    %149 = vector.shape_cast %146 : vector<8x128xf32> to vector<1x8x128xf32>
    tpu.vector_store %arg3[%c4_131, %c0_132, %c0_133], %149 {strides = array<i32>} : memref<8x8x128xf32, #tpu.memory_space<vmem>>, vector<1x8x128xf32>,
    %c5 = arith.constant 5 : index
    %c0_134 = arith.constant 0 : index
    %c0_135 = arith.constant 0 : index
    %150 = vector.load %arg1[%c5, %c0_134, %c0_135] : memref<8x8x128xi32, #tpu.memory_space<vmem>>, vector<1x8x128xi32>
    %151 = vector.shape_cast %150 : vector<1x8x128xi32> to vector<8x128xi32>
    %c0_136 = arith.constant 0 : index
    %c0_137 = arith.constant 0 : index
    %c0_138 = arith.constant 0 : index
    %152 = vector.load %arg3[%c0_136, %c0_137, %c0_138] : memref<8x8x128xf32, #tpu.memory_space<vmem>>, vector<1x8x128xf32>
    %153 = vector.shape_cast %152 : vector<1x8x128xf32> to vector<8x128xf32>
    %c4_139 = arith.constant 4 : index
    %c0_140 = arith.constant 0 : index
    %c0_141 = arith.constant 0 : index
    %154 = vector.load %arg3[%c4_139, %c0_140, %c0_141] : memref<8x8x128xf32, #tpu.memory_space<vmem>>, vector<1x8x128xf32>
    %155 = vector.shape_cast %154 : vector<1x8x128xf32> to vector<8x128xf32>
    %c127_i32_142 = arith.constant 127 : i32
    %156 = tpu.dynamic_rotate %155 by %c127_i32_142 dim 1 : vector<8x128xf32>, i32 -> vector<8x128xf32>
    %157 = arith.addf %153, %156 : vector<8x128xf32>
    %c5_143 = arith.constant 5 : index
    %c0_144 = arith.constant 0 : index
    %c0_145 = arith.constant 0 : index
    %c0_146 = arith.constant 0 : index
    %158 = vector.load %arg0[%c5_143, %c0_144, %c0_145, %c0_146] : memref<8x8x8x128xf32, #tpu.memory_space<vmem>>, vector<1x1x8x128xf32>
    %159 = vector.shape_cast %158 : vector<1x1x8x128xf32> to vector<8x128xf32>
    %160 = arith.addf %157, %159 : vector<8x128xf32>
    %c1_147 = arith.constant 1 : index
    %c0_148 = arith.constant 0 : index
    %c0_149 = arith.constant 0 : index
    %161 = vector.load %arg3[%c1_147, %c0_148, %c0_149] : memref<8x8x128xf32, #tpu.memory_space<vmem>>, vector<1x8x128xf32>
    %162 = vector.shape_cast %161 : vector<1x8x128xf32> to vector<8x128xf32>
    %c3_150 = arith.constant 3 : index
    %c0_151 = arith.constant 0 : index
    %c0_152 = arith.constant 0 : index
    %163 = vector.load %arg3[%c3_150, %c0_151, %c0_152] : memref<8x8x128xf32, #tpu.memory_space<vmem>>, vector<1x8x128xf32>
    %164 = vector.shape_cast %163 : vector<1x8x128xf32> to vector<8x128xf32>
    %c126_i32_153 = arith.constant 126 : i32
    %165 = tpu.dynamic_rotate %164 by %c126_i32_153 dim 1 : vector<8x128xf32>, i32 -> vector<8x128xf32>
    %166 = arith.addf %162, %165 : vector<8x128xf32>
    %c5_154 = arith.constant 5 : index
    %c1_155 = arith.constant 1 : index
    %c0_156 = arith.constant 0 : index
    %c0_157 = arith.constant 0 : index
    %167 = vector.load %arg0[%c5_154, %c1_155, %c0_156, %c0_157] : memref<8x8x8x128xf32, #tpu.memory_space<vmem>>, vector<1x1x8x128xf32>
    %168 = vector.shape_cast %167 : vector<1x1x8x128xf32> to vector<8x128xf32>
    %169 = arith.addf %166, %168 : vector<8x128xf32>
    %170 = arith.maximumf %160, %169 : vector<8x128xf32>
    %c1_i32_158 = arith.constant 1 : i32
    %171 = vector.broadcast %c1_i32_158 : i32 to vector<8x128xi32>
    %172 = arith.cmpi eq, %151, %171 : vector<8x128xi32>
    %173 = arith.select %172, %169, %160 : vector<8x128xi1>, vector<8x128xf32>
    %c2_159 = arith.constant 2 : index
    %c0_160 = arith.constant 0 : index
    %c0_161 = arith.constant 0 : index
    %174 = vector.load %arg3[%c2_159, %c0_160, %c0_161] : memref<8x8x128xf32, #tpu.memory_space<vmem>>, vector<1x8x128xf32>
    %175 = vector.shape_cast %174 : vector<1x8x128xf32> to vector<8x128xf32>
    %c2_162 = arith.constant 2 : index
    %c0_163 = arith.constant 0 : index
    %c0_164 = arith.constant 0 : index
    %176 = vector.load %arg3[%c2_162, %c0_163, %c0_164] : memref<8x8x128xf32, #tpu.memory_space<vmem>>, vector<1x8x128xf32>
    %177 = vector.shape_cast %176 : vector<1x8x128xf32> to vector<8x128xf32>
    %c125_i32_165 = arith.constant 125 : i32
    %178 = tpu.dynamic_rotate %177 by %c125_i32_165 dim 1 : vector<8x128xf32>, i32 -> vector<8x128xf32>
    %179 = arith.addf %175, %178 : vector<8x128xf32>
    %c5_166 = arith.constant 5 : index
    %c2_167 = arith.constant 2 : index
    %c0_168 = arith.constant 0 : index
    %c0_169 = arith.constant 0 : index
    %180 = vector.load %arg0[%c5_166, %c2_167, %c0_168, %c0_169] : memref<8x8x8x128xf32, #tpu.memory_space<vmem>>, vector<1x1x8x128xf32>
    %181 = vector.shape_cast %180 : vector<1x1x8x128xf32> to vector<8x128xf32>
    %182 = arith.addf %179, %181 : vector<8x128xf32>
    %183 = arith.maximumf %170, %182 : vector<8x128xf32>
    %c2_i32_170 = arith.constant 2 : i32
    %184 = vector.broadcast %c2_i32_170 : i32 to vector<8x128xi32>
    %185 = arith.cmpi eq, %151, %184 : vector<8x128xi32>
    %186 = arith.select %185, %182, %173 : vector<8x128xi1>, vector<8x128xf32>
    %c3_171 = arith.constant 3 : index
    %c0_172 = arith.constant 0 : index
    %c0_173 = arith.constant 0 : index
    %187 = vector.load %arg3[%c3_171, %c0_172, %c0_173] : memref<8x8x128xf32, #tpu.memory_space<vmem>>, vector<1x8x128xf32>
    %188 = vector.shape_cast %187 : vector<1x8x128xf32> to vector<8x128xf32>
    %c1_174 = arith.constant 1 : index
    %c0_175 = arith.constant 0 : index
    %c0_176 = arith.constant 0 : index
    %189 = vector.load %arg3[%c1_174, %c0_175, %c0_176] : memref<8x8x128xf32, #tpu.memory_space<vmem>>, vector<1x8x128xf32>
    %190 = vector.shape_cast %189 : vector<1x8x128xf32> to vector<8x128xf32>
    %c124_i32_177 = arith.constant 124 : i32
    %191 = tpu.dynamic_rotate %190 by %c124_i32_177 dim 1 : vector<8x128xf32>, i32 -> vector<8x128xf32>
    %192 = arith.addf %188, %191 : vector<8x128xf32>
    %c5_178 = arith.constant 5 : index
    %c3_179 = arith.constant 3 : index
    %c0_180 = arith.constant 0 : index
    %c0_181 = arith.constant 0 : index
    %193 = vector.load %arg0[%c5_178, %c3_179, %c0_180, %c0_181] : memref<8x8x8x128xf32, #tpu.memory_space<vmem>>, vector<1x1x8x128xf32>
    %194 = vector.shape_cast %193 : vector<1x1x8x128xf32> to vector<8x128xf32>
    %195 = arith.addf %192, %194 : vector<8x128xf32>
    %196 = arith.maximumf %183, %195 : vector<8x128xf32>
    %c3_i32_182 = arith.constant 3 : i32
    %197 = vector.broadcast %c3_i32_182 : i32 to vector<8x128xi32>
    %198 = arith.cmpi eq, %151, %197 : vector<8x128xi32>
    %199 = arith.select %198, %195, %186 : vector<8x128xi1>, vector<8x128xf32>
    %c4_183 = arith.constant 4 : index
    %c0_184 = arith.constant 0 : index
    %c0_185 = arith.constant 0 : index
    %200 = vector.load %arg3[%c4_183, %c0_184, %c0_185] : memref<8x8x128xf32, #tpu.memory_space<vmem>>, vector<1x8x128xf32>
    %201 = vector.shape_cast %200 : vector<1x8x128xf32> to vector<8x128xf32>
    %c0_186 = arith.constant 0 : index
    %c0_187 = arith.constant 0 : index
    %c0_188 = arith.constant 0 : index
    %202 = vector.load %arg3[%c0_186, %c0_187, %c0_188] : memref<8x8x128xf32, #tpu.memory_space<vmem>>, vector<1x8x128xf32>
    %203 = vector.shape_cast %202 : vector<1x8x128xf32> to vector<8x128xf32>
    %c123_i32 = arith.constant 123 : i32
    %204 = tpu.dynamic_rotate %203 by %c123_i32 dim 1 : vector<8x128xf32>, i32 -> vector<8x128xf32>
    %205 = arith.addf %201, %204 : vector<8x128xf32>
    %c5_189 = arith.constant 5 : index
    %c4_190 = arith.constant 4 : index
    %c0_191 = arith.constant 0 : index
    %c0_192 = arith.constant 0 : index
    %206 = vector.load %arg0[%c5_189, %c4_190, %c0_191, %c0_192] : memref<8x8x8x128xf32, #tpu.memory_space<vmem>>, vector<1x1x8x128xf32>
    %207 = vector.shape_cast %206 : vector<1x1x8x128xf32> to vector<8x128xf32>
    %208 = arith.addf %205, %207 : vector<8x128xf32>
    %209 = arith.maximumf %196, %208 : vector<8x128xf32>
    %c4_i32 = arith.constant 4 : i32
    %210 = vector.broadcast %c4_i32 : i32 to vector<8x128xi32>
    %211 = arith.cmpi eq, %151, %210 : vector<8x128xi32>
    %212 = arith.select %211, %208, %199 : vector<8x128xi1>, vector<8x128xf32>
    %c0_i32_193 = arith.constant 0 : i32
    %213 = vector.broadcast %c0_i32_193 : i32 to vector<8x128xi32>
    %214 = arith.cmpi sge, %151, %213 : vector<8x128xi32>
    %215 = arith.select %214, %212, %209 : vector<8x128xi1>, vector<8x128xf32>
    %c5_194 = arith.constant 5 : index
    %c0_195 = arith.constant 0 : index
    %c0_196 = arith.constant 0 : index
    %216 = vector.load %arg3[%c5_194, %c0_195, %c0_196] : memref<8x8x128xf32, #tpu.memory_space<vmem>>, vector<1x8x128xf32>
    %217 = vector.shape_cast %216 : vector<1x8x128xf32> to vector<8x128xf32>
    %218 = vector.shape_cast %215 : vector<8x128xf32> to vector<1x8x128xf32>
    tpu.vector_store %arg3[%c5_194, %c0_195, %c0_196], %218 {strides = array<i32>} : memref<8x8x128xf32, #tpu.memory_space<vmem>>, vector<1x8x128xf32>,
    %c6 = arith.constant 6 : index
    %c0_197 = arith.constant 0 : index
    %c0_198 = arith.constant 0 : index
    %219 = vector.load %arg1[%c6, %c0_197, %c0_198] : memref<8x8x128xi32, #tpu.memory_space<vmem>>, vector<1x8x128xi32>
    %220 = vector.shape_cast %219 : vector<1x8x128xi32> to vector<8x128xi32>
    %c0_199 = arith.constant 0 : index
    %c0_200 = arith.constant 0 : index
    %c0_201 = arith.constant 0 : index
    %221 = vector.load %arg3[%c0_199, %c0_200, %c0_201] : memref<8x8x128xf32, #tpu.memory_space<vmem>>, vector<1x8x128xf32>
    %222 = vector.shape_cast %221 : vector<1x8x128xf32> to vector<8x128xf32>
    %c5_202 = arith.constant 5 : index
    %c0_203 = arith.constant 0 : index
    %c0_204 = arith.constant 0 : index
    %223 = vector.load %arg3[%c5_202, %c0_203, %c0_204] : memref<8x8x128xf32, #tpu.memory_space<vmem>>, vector<1x8x128xf32>
    %224 = vector.shape_cast %223 : vector<1x8x128xf32> to vector<8x128xf32>
    %c127_i32_205 = arith.constant 127 : i32
    %225 = tpu.dynamic_rotate %224 by %c127_i32_205 dim 1 : vector<8x128xf32>, i32 -> vector<8x128xf32>
    %226 = arith.addf %222, %225 : vector<8x128xf32>
    %c6_206 = arith.constant 6 : index
    %c0_207 = arith.constant 0 : index
    %c0_208 = arith.constant 0 : index
    %c0_209 = arith.constant 0 : index
    %227 = vector.load %arg0[%c6_206, %c0_207, %c0_208, %c0_209] : memref<8x8x8x128xf32, #tpu.memory_space<vmem>>, vector<1x1x8x128xf32>
    %228 = vector.shape_cast %227 : vector<1x1x8x128xf32> to vector<8x128xf32>
    %229 = arith.addf %226, %228 : vector<8x128xf32>
    %c1_210 = arith.constant 1 : index
    %c0_211 = arith.constant 0 : index
    %c0_212 = arith.constant 0 : index
    %230 = vector.load %arg3[%c1_210, %c0_211, %c0_212] : memref<8x8x128xf32, #tpu.memory_space<vmem>>, vector<1x8x128xf32>
    %231 = vector.shape_cast %230 : vector<1x8x128xf32> to vector<8x128xf32>
    %c4_213 = arith.constant 4 : index
    %c0_214 = arith.constant 0 : index
    %c0_215 = arith.constant 0 : index
    %232 = vector.load %arg3[%c4_213, %c0_214, %c0_215] : memref<8x8x128xf32, #tpu.memory_space<vmem>>, vector<1x8x128xf32>
    %233 = vector.shape_cast %232 : vector<1x8x128xf32> to vector<8x128xf32>
    %c126_i32_216 = arith.constant 126 : i32
    %234 = tpu.dynamic_rotate %233 by %c126_i32_216 dim 1 : vector<8x128xf32>, i32 -> vector<8x128xf32>
    %235 = arith.addf %231, %234 : vector<8x128xf32>
    %c6_217 = arith.constant 6 : index
    %c1_218 = arith.constant 1 : index
    %c0_219 = arith.constant 0 : index
    %c0_220 = arith.constant 0 : index
    %236 = vector.load %arg0[%c6_217, %c1_218, %c0_219, %c0_220] : memref<8x8x8x128xf32, #tpu.memory_space<vmem>>, vector<1x1x8x128xf32>
    %237 = vector.shape_cast %236 : vector<1x1x8x128xf32> to vector<8x128xf32>
    %238 = arith.addf %235, %237 : vector<8x128xf32>
    %239 = arith.maximumf %229, %238 : vector<8x128xf32>
    %c1_i32_221 = arith.constant 1 : i32
    %240 = vector.broadcast %c1_i32_221 : i32 to vector<8x128xi32>
    %241 = arith.cmpi eq, %220, %240 : vector<8x128xi32>
    %242 = arith.select %241, %238, %229 : vector<8x128xi1>, vector<8x128xf32>
    %c2_222 = arith.constant 2 : index
    %c0_223 = arith.constant 0 : index
    %c0_224 = arith.constant 0 : index
    %243 = vector.load %arg3[%c2_222, %c0_223, %c0_224] : memref<8x8x128xf32, #tpu.memory_space<vmem>>, vector<1x8x128xf32>
    %244 = vector.shape_cast %243 : vector<1x8x128xf32> to vector<8x128xf32>
    %c3_225 = arith.constant 3 : index
    %c0_226 = arith.constant 0 : index
    %c0_227 = arith.constant 0 : index
    %245 = vector.load %arg3[%c3_225, %c0_226, %c0_227] : memref<8x8x128xf32, #tpu.memory_space<vmem>>, vector<1x8x128xf32>
    %246 = vector.shape_cast %245 : vector<1x8x128xf32> to vector<8x128xf32>
    %c125_i32_228 = arith.constant 125 : i32
    %247 = tpu.dynamic_rotate %246 by %c125_i32_228 dim 1 : vector<8x128xf32>, i32 -> vector<8x128xf32>
    %248 = arith.addf %244, %247 : vector<8x128xf32>
    %c6_229 = arith.constant 6 : index
    %c2_230 = arith.constant 2 : index
    %c0_231 = arith.constant 0 : index
    %c0_232 = arith.constant 0 : index
    %249 = vector.load %arg0[%c6_229, %c2_230, %c0_231, %c0_232] : memref<8x8x8x128xf32, #tpu.memory_space<vmem>>, vector<1x1x8x128xf32>
    %250 = vector.shape_cast %249 : vector<1x1x8x128xf32> to vector<8x128xf32>
    %251 = arith.addf %248, %250 : vector<8x128xf32>
    %252 = arith.maximumf %239, %251 : vector<8x128xf32>
    %c2_i32_233 = arith.constant 2 : i32
    %253 = vector.broadcast %c2_i32_233 : i32 to vector<8x128xi32>
    %254 = arith.cmpi eq, %220, %253 : vector<8x128xi32>
    %255 = arith.select %254, %251, %242 : vector<8x128xi1>, vector<8x128xf32>
    %c3_234 = arith.constant 3 : index
    %c0_235 = arith.constant 0 : index
    %c0_236 = arith.constant 0 : index
    %256 = vector.load %arg3[%c3_234, %c0_235, %c0_236] : memref<8x8x128xf32, #tpu.memory_space<vmem>>, vector<1x8x128xf32>
    %257 = vector.shape_cast %256 : vector<1x8x128xf32> to vector<8x128xf32>
    %c2_237 = arith.constant 2 : index
    %c0_238 = arith.constant 0 : index
    %c0_239 = arith.constant 0 : index
    %258 = vector.load %arg3[%c2_237, %c0_238, %c0_239] : memref<8x8x128xf32, #tpu.memory_space<vmem>>, vector<1x8x128xf32>
    %259 = vector.shape_cast %258 : vector<1x8x128xf32> to vector<8x128xf32>
    %c124_i32_240 = arith.constant 124 : i32
    %260 = tpu.dynamic_rotate %259 by %c124_i32_240 dim 1 : vector<8x128xf32>, i32 -> vector<8x128xf32>
    %261 = arith.addf %257, %260 : vector<8x128xf32>
    %c6_241 = arith.constant 6 : index
    %c3_242 = arith.constant 3 : index
    %c0_243 = arith.constant 0 : index
    %c0_244 = arith.constant 0 : index
    %262 = vector.load %arg0[%c6_241, %c3_242, %c0_243, %c0_244] : memref<8x8x8x128xf32, #tpu.memory_space<vmem>>, vector<1x1x8x128xf32>
    %263 = vector.shape_cast %262 : vector<1x1x8x128xf32> to vector<8x128xf32>
    %264 = arith.addf %261, %263 : vector<8x128xf32>
    %265 = arith.maximumf %252, %264 : vector<8x128xf32>
    %c3_i32_245 = arith.constant 3 : i32
    %266 = vector.broadcast %c3_i32_245 : i32 to vector<8x128xi32>
    %267 = arith.cmpi eq, %220, %266 : vector<8x128xi32>
    %268 = arith.select %267, %264, %255 : vector<8x128xi1>, vector<8x128xf32>
    %c4_246 = arith.constant 4 : index
    %c0_247 = arith.constant 0 : index
    %c0_248 = arith.constant 0 : index
    %269 = vector.load %arg3[%c4_246, %c0_247, %c0_248] : memref<8x8x128xf32, #tpu.memory_space<vmem>>, vector<1x8x128xf32>
    %270 = vector.shape_cast %269 : vector<1x8x128xf32> to vector<8x128xf32>
    %c1_249 = arith.constant 1 : index
    %c0_250 = arith.constant 0 : index
    %c0_251 = arith.constant 0 : index
    %271 = vector.load %arg3[%c1_249, %c0_250, %c0_251] : memref<8x8x128xf32, #tpu.memory_space<vmem>>, vector<1x8x128xf32>
    %272 = vector.shape_cast %271 : vector<1x8x128xf32> to vector<8x128xf32>
    %c123_i32_252 = arith.constant 123 : i32
    %273 = tpu.dynamic_rotate %272 by %c123_i32_252 dim 1 : vector<8x128xf32>, i32 -> vector<8x128xf32>
    %274 = arith.addf %270, %273 : vector<8x128xf32>
    %c6_253 = arith.constant 6 : index
    %c4_254 = arith.constant 4 : index
    %c0_255 = arith.constant 0 : index
    %c0_256 = arith.constant 0 : index
    %275 = vector.load %arg0[%c6_253, %c4_254, %c0_255, %c0_256] : memref<8x8x8x128xf32, #tpu.memory_space<vmem>>, vector<1x1x8x128xf32>
    %276 = vector.shape_cast %275 : vector<1x1x8x128xf32> to vector<8x128xf32>
    %277 = arith.addf %274, %276 : vector<8x128xf32>
    %278 = arith.maximumf %265, %277 : vector<8x128xf32>
    %c4_i32_257 = arith.constant 4 : i32
    %279 = vector.broadcast %c4_i32_257 : i32 to vector<8x128xi32>
    %280 = arith.cmpi eq, %220, %279 : vector<8x128xi32>
    %281 = arith.select %280, %277, %268 : vector<8x128xi1>, vector<8x128xf32>
    %c5_258 = arith.constant 5 : index
    %c0_259 = arith.constant 0 : index
    %c0_260 = arith.constant 0 : index
    %282 = vector.load %arg3[%c5_258, %c0_259, %c0_260] : memref<8x8x128xf32, #tpu.memory_space<vmem>>, vector<1x8x128xf32>
    %283 = vector.shape_cast %282 : vector<1x8x128xf32> to vector<8x128xf32>
    %c0_261 = arith.constant 0 : index
    %c0_262 = arith.constant 0 : index
    %c0_263 = arith.constant 0 : index
    %284 = vector.load %arg3[%c0_261, %c0_262, %c0_263] : memref<8x8x128xf32, #tpu.memory_space<vmem>>, vector<1x8x128xf32>
    %285 = vector.shape_cast %284 : vector<1x8x128xf32> to vector<8x128xf32>
    %c122_i32 = arith.constant 122 : i32
    %286 = tpu.dynamic_rotate %285 by %c122_i32 dim 1 : vector<8x128xf32>, i32 -> vector<8x128xf32>
    %287 = arith.addf %283, %286 : vector<8x128xf32>
    %c6_264 = arith.constant 6 : index
    %c5_265 = arith.constant 5 : index
    %c0_266 = arith.constant 0 : index
    %c0_267 = arith.constant 0 : index
    %288 = vector.load %arg0[%c6_264, %c5_265, %c0_266, %c0_267] : memref<8x8x8x128xf32, #tpu.memory_space<vmem>>, vector<1x1x8x128xf32>
    %289 = vector.shape_cast %288 : vector<1x1x8x128xf32> to vector<8x128xf32>
    %290 = arith.addf %287, %289 : vector<8x128xf32>
    %291 = arith.maximumf %278, %290 : vector<8x128xf32>
    %c5_i32 = arith.constant 5 : i32
    %292 = vector.broadcast %c5_i32 : i32 to vector<8x128xi32>
    %293 = arith.cmpi eq, %220, %292 : vector<8x128xi32>
    %294 = arith.select %293, %290, %281 : vector<8x128xi1>, vector<8x128xf32>
    %c0_i32_268 = arith.constant 0 : i32
    %295 = vector.broadcast %c0_i32_268 : i32 to vector<8x128xi32>
    %296 = arith.cmpi sge, %220, %295 : vector<8x128xi32>
    %297 = arith.select %296, %294, %291 : vector<8x128xi1>, vector<8x128xf32>
    %c6_269 = arith.constant 6 : index
    %c0_270 = arith.constant 0 : index
    %c0_271 = arith.constant 0 : index
    %298 = vector.load %arg3[%c6_269, %c0_270, %c0_271] : memref<8x8x128xf32, #tpu.memory_space<vmem>>, vector<1x8x128xf32>
    %299 = vector.shape_cast %298 : vector<1x8x128xf32> to vector<8x128xf32>
    %300 = vector.shape_cast %297 : vector<8x128xf32> to vector<1x8x128xf32>
    tpu.vector_store %arg3[%c6_269, %c0_270, %c0_271], %300 {strides = array<i32>} : memref<8x8x128xf32, #tpu.memory_space<vmem>>, vector<1x8x128xf32>,
    %c7 = arith.constant 7 : index
    %c0_272 = arith.constant 0 : index
    %c0_273 = arith.constant 0 : index
    %301 = vector.load %arg1[%c7, %c0_272, %c0_273] : memref<8x8x128xi32, #tpu.memory_space<vmem>>, vector<1x8x128xi32>
    %302 = vector.shape_cast %301 : vector<1x8x128xi32> to vector<8x128xi32>
    %c0_274 = arith.constant 0 : index
    %c0_275 = arith.constant 0 : index
    %c0_276 = arith.constant 0 : index
    %303 = vector.load %arg3[%c0_274, %c0_275, %c0_276] : memref<8x8x128xf32, #tpu.memory_space<vmem>>, vector<1x8x128xf32>
    %304 = vector.shape_cast %303 : vector<1x8x128xf32> to vector<8x128xf32>
    %c6_277 = arith.constant 6 : index
    %c0_278 = arith.constant 0 : index
    %c0_279 = arith.constant 0 : index
    %305 = vector.load %arg3[%c6_277, %c0_278, %c0_279] : memref<8x8x128xf32, #tpu.memory_space<vmem>>, vector<1x8x128xf32>
    %306 = vector.shape_cast %305 : vector<1x8x128xf32> to vector<8x128xf32>
    %c127_i32_280 = arith.constant 127 : i32
    %307 = tpu.dynamic_rotate %306 by %c127_i32_280 dim 1 : vector<8x128xf32>, i32 -> vector<8x128xf32>
    %308 = arith.addf %304, %307 : vector<8x128xf32>
    %c7_281 = arith.constant 7 : index
    %c0_282 = arith.constant 0 : index
    %c0_283 = arith.constant 0 : index
    %c0_284 = arith.constant 0 : index
    %309 = vector.load %arg0[%c7_281, %c0_282, %c0_283, %c0_284] : memref<8x8x8x128xf32, #tpu.memory_space<vmem>>, vector<1x1x8x128xf32>
    %310 = vector.shape_cast %309 : vector<1x1x8x128xf32> to vector<8x128xf32>
    %311 = arith.addf %308, %310 : vector<8x128xf32>
    %c1_285 = arith.constant 1 : index
    %c0_286 = arith.constant 0 : index
    %c0_287 = arith.constant 0 : index
    %312 = vector.load %arg3[%c1_285, %c0_286, %c0_287] : memref<8x8x128xf32, #tpu.memory_space<vmem>>, vector<1x8x128xf32>
    %313 = vector.shape_cast %312 : vector<1x8x128xf32> to vector<8x128xf32>
    %c5_288 = arith.constant 5 : index
    %c0_289 = arith.constant 0 : index
    %c0_290 = arith.constant 0 : index
    %314 = vector.load %arg3[%c5_288, %c0_289, %c0_290] : memref<8x8x128xf32, #tpu.memory_space<vmem>>, vector<1x8x128xf32>
    %315 = vector.shape_cast %314 : vector<1x8x128xf32> to vector<8x128xf32>
    %c126_i32_291 = arith.constant 126 : i32
    %316 = tpu.dynamic_rotate %315 by %c126_i32_291 dim 1 : vector<8x128xf32>, i32 -> vector<8x128xf32>
    %317 = arith.addf %313, %316 : vector<8x128xf32>
    %c7_292 = arith.constant 7 : index
    %c1_293 = arith.constant 1 : index
    %c0_294 = arith.constant 0 : index
    %c0_295 = arith.constant 0 : index
    %318 = vector.load %arg0[%c7_292, %c1_293, %c0_294, %c0_295] : memref<8x8x8x128xf32, #tpu.memory_space<vmem>>, vector<1x1x8x128xf32>
    %319 = vector.shape_cast %318 : vector<1x1x8x128xf32> to vector<8x128xf32>
    %320 = arith.addf %317, %319 : vector<8x128xf32>
    %321 = arith.maximumf %311, %320 : vector<8x128xf32>
    %c1_i32_296 = arith.constant 1 : i32
    %322 = vector.broadcast %c1_i32_296 : i32 to vector<8x128xi32>
    %323 = arith.cmpi eq, %302, %322 : vector<8x128xi32>
    %324 = arith.select %323, %320, %311 : vector<8x128xi1>, vector<8x128xf32>
    %c2_297 = arith.constant 2 : index
    %c0_298 = arith.constant 0 : index
    %c0_299 = arith.constant 0 : index
    %325 = vector.load %arg3[%c2_297, %c0_298, %c0_299] : memref<8x8x128xf32, #tpu.memory_space<vmem>>, vector<1x8x128xf32>
    %326 = vector.shape_cast %325 : vector<1x8x128xf32> to vector<8x128xf32>
    %c4_300 = arith.constant 4 : index
    %c0_301 = arith.constant 0 : index
    %c0_302 = arith.constant 0 : index
    %327 = vector.load %arg3[%c4_300, %c0_301, %c0_302] : memref<8x8x128xf32, #tpu.memory_space<vmem>>, vector<1x8x128xf32>
    %328 = vector.shape_cast %327 : vector<1x8x128xf32> to vector<8x128xf32>
    %c125_i32_303 = arith.constant 125 : i32
    %329 = tpu.dynamic_rotate %328 by %c125_i32_303 dim 1 : vector<8x128xf32>, i32 -> vector<8x128xf32>
    %330 = arith.addf %326, %329 : vector<8x128xf32>
    %c7_304 = arith.constant 7 : index
    %c2_305 = arith.constant 2 : index
    %c0_306 = arith.constant 0 : index
    %c0_307 = arith.constant 0 : index
    %331 = vector.load %arg0[%c7_304, %c2_305, %c0_306, %c0_307] : memref<8x8x8x128xf32, #tpu.memory_space<vmem>>, vector<1x1x8x128xf32>
    %332 = vector.shape_cast %331 : vector<1x1x8x128xf32> to vector<8x128xf32>
    %333 = arith.addf %330, %332 : vector<8x128xf32>
    %334 = arith.maximumf %321, %333 : vector<8x128xf32>
    %c2_i32_308 = arith.constant 2 : i32
    %335 = vector.broadcast %c2_i32_308 : i32 to vector<8x128xi32>
    %336 = arith.cmpi eq, %302, %335 : vector<8x128xi32>
    %337 = arith.select %336, %333, %324 : vector<8x128xi1>, vector<8x128xf32>
    %c3_309 = arith.constant 3 : index
    %c0_310 = arith.constant 0 : index
    %c0_311 = arith.constant 0 : index
    %338 = vector.load %arg3[%c3_309, %c0_310, %c0_311] : memref<8x8x128xf32, #tpu.memory_space<vmem>>, vector<1x8x128xf32>
    %339 = vector.shape_cast %338 : vector<1x8x128xf32> to vector<8x128xf32>
    %c3_312 = arith.constant 3 : index
    %c0_313 = arith.constant 0 : index
    %c0_314 = arith.constant 0 : index
    %340 = vector.load %arg3[%c3_312, %c0_313, %c0_314] : memref<8x8x128xf32, #tpu.memory_space<vmem>>, vector<1x8x128xf32>
    %341 = vector.shape_cast %340 : vector<1x8x128xf32> to vector<8x128xf32>
    %c124_i32_315 = arith.constant 124 : i32
    %342 = tpu.dynamic_rotate %341 by %c124_i32_315 dim 1 : vector<8x128xf32>, i32 -> vector<8x128xf32>
    %343 = arith.addf %339, %342 : vector<8x128xf32>
    %c7_316 = arith.constant 7 : index
    %c3_317 = arith.constant 3 : index
    %c0_318 = arith.constant 0 : index
    %c0_319 = arith.constant 0 : index
    %344 = vector.load %arg0[%c7_316, %c3_317, %c0_318, %c0_319] : memref<8x8x8x128xf32, #tpu.memory_space<vmem>>, vector<1x1x8x128xf32>
    %345 = vector.shape_cast %344 : vector<1x1x8x128xf32> to vector<8x128xf32>
    %346 = arith.addf %343, %345 : vector<8x128xf32>
    %347 = arith.maximumf %334, %346 : vector<8x128xf32>
    %c3_i32_320 = arith.constant 3 : i32
    %348 = vector.broadcast %c3_i32_320 : i32 to vector<8x128xi32>
    %349 = arith.cmpi eq, %302, %348 : vector<8x128xi32>
    %350 = arith.select %349, %346, %337 : vector<8x128xi1>, vector<8x128xf32>
    %c4_321 = arith.constant 4 : index
    %c0_322 = arith.constant 0 : index
    %c0_323 = arith.constant 0 : index
    %351 = vector.load %arg3[%c4_321, %c0_322, %c0_323] : memref<8x8x128xf32, #tpu.memory_space<vmem>>, vector<1x8x128xf32>
    %352 = vector.shape_cast %351 : vector<1x8x128xf32> to vector<8x128xf32>
    %c2_324 = arith.constant 2 : index
    %c0_325 = arith.constant 0 : index
    %c0_326 = arith.constant 0 : index
    %353 = vector.load %arg3[%c2_324, %c0_325, %c0_326] : memref<8x8x128xf32, #tpu.memory_space<vmem>>, vector<1x8x128xf32>
    %354 = vector.shape_cast %353 : vector<1x8x128xf32> to vector<8x128xf32>
    %c123_i32_327 = arith.constant 123 : i32
    %355 = tpu.dynamic_rotate %354 by %c123_i32_327 dim 1 : vector<8x128xf32>, i32 -> vector<8x128xf32>
    %356 = arith.addf %352, %355 : vector<8x128xf32>
    %c7_328 = arith.constant 7 : index
    %c4_329 = arith.constant 4 : index
    %c0_330 = arith.constant 0 : index
    %c0_331 = arith.constant 0 : index
    %357 = vector.load %arg0[%c7_328, %c4_329, %c0_330, %c0_331] : memref<8x8x8x128xf32, #tpu.memory_space<vmem>>, vector<1x1x8x128xf32>
    %358 = vector.shape_cast %357 : vector<1x1x8x128xf32> to vector<8x128xf32>
    %359 = arith.addf %356, %358 : vector<8x128xf32>
    %360 = arith.maximumf %347, %359 : vector<8x128xf32>
    %c4_i32_332 = arith.constant 4 : i32
    %361 = vector.broadcast %c4_i32_332 : i32 to vector<8x128xi32>
    %362 = arith.cmpi eq, %302, %361 : vector<8x128xi32>
    %363 = arith.select %362, %359, %350 : vector<8x128xi1>, vector<8x128xf32>
    %c5_333 = arith.constant 5 : index
    %c0_334 = arith.constant 0 : index
    %c0_335 = arith.constant 0 : index
    %364 = vector.load %arg3[%c5_333, %c0_334, %c0_335] : memref<8x8x128xf32, #tpu.memory_space<vmem>>, vector<1x8x128xf32>
    %365 = vector.shape_cast %364 : vector<1x8x128xf32> to vector<8x128xf32>
    %c1_336 = arith.constant 1 : index
    %c0_337 = arith.constant 0 : index
    %c0_338 = arith.constant 0 : index
    %366 = vector.load %arg3[%c1_336, %c0_337, %c0_338] : memref<8x8x128xf32, #tpu.memory_space<vmem>>, vector<1x8x128xf32>
    %367 = vector.shape_cast %366 : vector<1x8x128xf32> to vector<8x128xf32>
    %c122_i32_339 = arith.constant 122 : i32
    %368 = tpu.dynamic_rotate %367 by %c122_i32_339 dim 1 : vector<8x128xf32>, i32 -> vector<8x128xf32>
    %369 = arith.addf %365, %368 : vector<8x128xf32>
    %c7_340 = arith.constant 7 : index
    %c5_341 = arith.constant 5 : index
    %c0_342 = arith.constant 0 : index
    %c0_343 = arith.constant 0 : index
    %370 = vector.load %arg0[%c7_340, %c5_341, %c0_342, %c0_343] : memref<8x8x8x128xf32, #tpu.memory_space<vmem>>, vector<1x1x8x128xf32>
    %371 = vector.shape_cast %370 : vector<1x1x8x128xf32> to vector<8x128xf32>
    %372 = arith.addf %369, %371 : vector<8x128xf32>
    %373 = arith.maximumf %360, %372 : vector<8x128xf32>
    %c5_i32_344 = arith.constant 5 : i32
    %374 = vector.broadcast %c5_i32_344 : i32 to vector<8x128xi32>
    %375 = arith.cmpi eq, %302, %374 : vector<8x128xi32>
    %376 = arith.select %375, %372, %363 : vector<8x128xi1>, vector<8x128xf32>
    %c6_345 = arith.constant 6 : index
    %c0_346 = arith.constant 0 : index
    %c0_347 = arith.constant 0 : index
    %377 = vector.load %arg3[%c6_345, %c0_346, %c0_347] : memref<8x8x128xf32, #tpu.memory_space<vmem>>, vector<1x8x128xf32>
    %378 = vector.shape_cast %377 : vector<1x8x128xf32> to vector<8x128xf32>
    %c0_348 = arith.constant 0 : index
    %c0_349 = arith.constant 0 : index
    %c0_350 = arith.constant 0 : index
    %379 = vector.load %arg3[%c0_348, %c0_349, %c0_350] : memref<8x8x128xf32, #tpu.memory_space<vmem>>, vector<1x8x128xf32>
    %380 = vector.shape_cast %379 : vector<1x8x128xf32> to vector<8x128xf32>
    %c121_i32 = arith.constant 121 : i32
    %381 = tpu.dynamic_rotate %380 by %c121_i32 dim 1 : vector<8x128xf32>, i32 -> vector<8x128xf32>
    %382 = arith.addf %378, %381 : vector<8x128xf32>
    %c7_351 = arith.constant 7 : index
    %c6_352 = arith.constant 6 : index
    %c0_353 = arith.constant 0 : index
    %c0_354 = arith.constant 0 : index
    %383 = vector.load %arg0[%c7_351, %c6_352, %c0_353, %c0_354] : memref<8x8x8x128xf32, #tpu.memory_space<vmem>>, vector<1x1x8x128xf32>
    %384 = vector.shape_cast %383 : vector<1x1x8x128xf32> to vector<8x128xf32>
    %385 = arith.addf %382, %384 : vector<8x128xf32>
    %386 = arith.maximumf %373, %385 : vector<8x128xf32>
    %c6_i32 = arith.constant 6 : i32
    %387 = vector.broadcast %c6_i32 : i32 to vector<8x128xi32>
    %388 = arith.cmpi eq, %302, %387 : vector<8x128xi32>
    %389 = arith.select %388, %385, %376 : vector<8x128xi1>, vector<8x128xf32>
    %c0_i32_355 = arith.constant 0 : i32
    %390 = vector.broadcast %c0_i32_355 : i32 to vector<8x128xi32>
    %391 = arith.cmpi sge, %302, %390 : vector<8x128xi32>
    %392 = arith.select %391, %389, %386 : vector<8x128xi1>, vector<8x128xf32>
    %c7_356 = arith.constant 7 : index
    %c0_357 = arith.constant 0 : index
    %c0_358 = arith.constant 0 : index
    %393 = vector.load %arg3[%c7_356, %c0_357, %c0_358] : memref<8x8x128xf32, #tpu.memory_space<vmem>>, vector<1x8x128xf32>
    %394 = vector.shape_cast %393 : vector<1x8x128xf32> to vector<8x128xf32>
    %395 = vector.shape_cast %392 : vector<8x128xf32> to vector<1x8x128xf32>
    tpu.vector_store %arg3[%c7_356, %c0_357, %c0_358], %395 {strides = array<i32>} : memref<8x8x128xf32, #tpu.memory_space<vmem>>, vector<1x8x128xf32>,
    %c7_359 = arith.constant 7 : index
    %c0_360 = arith.constant 0 : index
    %c0_361 = arith.constant 0 : index
    %396 = vector.load %arg3[%c7_359, %c0_360, %c0_361] : memref<8x8x128xf32, #tpu.memory_space<vmem>>, vector<1x8x128xf32>
    %397 = vector.shape_cast %396 : vector<1x8x128xf32> to vector<8x128xf32>
    %c0_362 = arith.constant 0 : index
    %c0_363 = arith.constant 0 : index
    %398 = vector.load %arg2[%c0_362, %c0_363] : memref<8x128xf32, #tpu.memory_space<vmem>>, vector<8x128xf32>
    tpu.vector_store %arg2[%c0_362, %c0_363], %397 {strides = array<i32>} : memref<8x128xf32, #tpu.memory_space<vmem>>, vector<8x128xf32>,
    %399 = tpu.iota {dimensions = array<i32: 0>} : vector<8x128xi32>
    %400 = tpu.iota {dimensions = array<i32: 1>} : vector<8x128xi32>
    %c2_i32_364 = arith.constant 2 : i32
    %401 = vector.broadcast %c2_i32_364 : i32 to vector<8x128xi32>
    %402 = arith.cmpi slt, %399, %401 : vector<8x128xi32>
    %c0_i32_365 = arith.constant 0 : i32
    %403 = vector.broadcast %c0_i32_365 : i32 to vector<8x128xi32>
    %404 = arith.cmpi eq, %400, %403 : vector<8x128xi32>
    %405 = arith.andi %402, %404 : vector<8x128xi1>
    %c2_i32_366 = arith.constant 2 : i32
    %406 = vector.broadcast %c2_i32_366 : i32 to vector<8x128xi32>
    %407 = arith.cmpi sge, %399, %406 : vector<8x128xi32>
    %c4_i32_367 = arith.constant 4 : i32
    %408 = vector.broadcast %c4_i32_367 : i32 to vector<8x128xi32>
    %409 = arith.cmpi slt, %399, %408 : vector<8x128xi32>
    %410 = arith.andi %407, %409 : vector<8x128xi1>
    %c0_i32_368 = arith.constant 0 : i32
    %411 = vector.broadcast %c0_i32_368 : i32 to vector<8x128xi32>
    %412 = arith.cmpi eq, %400, %411 : vector<8x128xi32>
    %413 = arith.andi %410, %412 : vector<8x128xi1>
    %cst_369 = arith.constant 0.000000e+00 : f32
    %414 = vector.broadcast %cst_369 : f32 to vector<8x128xf32>
    %415 = arith.select %413, %397, %414 : vector<8x128xi1>, vector<8x128xf32>
    %cst_370 = arith.constant 0.000000e+00 : f32
    %416 = vector.broadcast %cst_370 : f32 to vector<8x128xf32>
    %417 = arith.select %405, %397, %416 : vector<8x128xi1>, vector<8x128xf32>
    %418 = arith.subf %415, %417 : vector<8x128xf32>
    %419 = vector.shape_cast %418 : vector<8x128xf32> to vector<1x8x128xf32>
    %cst_371 = arith.constant dense<0.000000e+00> : vector<1xf32>
    %420 = vector.multi_reduction <add>, %419, %cst_371 [1, 2] : vector<1x8x128xf32> to vector<1xf32>
    %421 = vector.shape_cast %420 : vector<1xf32> to vector<1x1x1xf32>
    %422 = vector.extract %421[0, 0, 0] : f32 from vector<1x1x1xf32>
    %423 = vector.broadcast %422 : f32 to vector<1x1xf32>
    %cst_372 = arith.constant 2.000000e+00 : f32
    %424 = vector.broadcast %cst_372 : f32 to vector<1x1xf32>
    %425 = arith.divf %423, %424 : vector<1x1xf32>
    %cst_373 = arith.constant 1.000000e+00 : f32
    %426 = vector.broadcast %cst_373 : f32 to vector<1x1xf32>
    %427 = arith.addf %425, %426 : vector<1x1xf32>
    %c0_374 = arith.constant 0 : index
    %c1_375 = arith.constant 1 : index
    %428 = vector.load %arg2[%c0_374, %c1_375] : memref<8x128xf32, #tpu.memory_space<vmem>>, vector<1x1xf32>
    tpu.vector_store %arg2[%c0_374, %c1_375], %427 {strides = array<i32>} : memref<8x128xf32, #tpu.memory_space<vmem>>, vector<1x1xf32>,
    return
  }
}

</mosaic_0001>

<bundles_post_ra>
// kernel: tpu_custom_call.1
= control target key start
LH: loop header
LB: loop body
LE: loop exit
PB: predicated region body
PF: predicated region fallthrough
CT: control target
= control target key end

     0   :  { %7 = vsyncpa [#allocation4], 0  ;;  %s615_s0 = inlined_call_operand.hbm [shape: f32[8,8,8,128], index: 0, kind: input, shape index: {}]   ;;  %s616_s1 = inlined_call_operand.hbm [shape: s32[8,8,128], index: 1, kind: input, shape index: {}]   ;;  %s617_s2 = inlined_call_operand.hbm [shape: f32[8,128], index: 2, kind: output, shape index: {}]  }
   0x1   :  { %8 = vsyncpa [#allocation7], 0 }
   0x2   :  { %9 = vsyncpa [#allocation5], 0  ;;  %s14_s11 = sshll.u32 %s615_s0, 4  ;;  %s493_s12 = smov [#allocation3]   ;;  %s15_s11 = int_to_ptr.hbm [resolvable:$true] %s14_s11 }
   0x3   :  { %s16_s13 = sshll.u32 %s493_s12, 4  ;;  %s27_s16 = sshll.u32 %s616_s1, 4  ;;  %s17_s13 = int_to_ptr.vmem [resolvable:$true] %s16_s13  ;;  %s28_s16 = int_to_ptr.hbm [resolvable:$true] %s27_s16 }
   0x4   :  { %s494_s17 = smov 128   ;;  %s495_s18 = smov 8  }
   0x5   :  { %22 = dma.hbm_to_vmem [thread:$0]  %s15_s11, 8192, %s17_s13, [#allocation4], %s494_s17, %s494_s17, %s495_s18  }
   0x6   :  { %s496_s19 = smov [#allocation6]  }
   0x7   :  { %s29_s20 = sshll.u32 %s496_s19, 4  ;;  %s30_s20 = int_to_ptr.vmem [resolvable:$true] %s29_s20 }
   0x8   :  { %35 = dma.hbm_to_vmem [thread:$0]  %s28_s16, 1024, %s30_s20, [#allocation7], %s494_s17, %s494_s17, %s495_s18  }
   0x9   :  { %487 = dma.done.wait [#allocation4], 8192  }
   0xa   :  { %488 = vsyncadd [#allocation4], 4294959104 }
   0xb   :  { %489 = dma.done.wait [#allocation7], 1024  }
   0xc   :  { %490 = vsyncadd [#allocation7], 4294966272  ;;  %v497_v0 = vmov 1.0   ;;  %s498_s0 = smov 127   ;;  %s499_s21 = smov 126   ;;  %v50_v2 = vld [vmem:[#allocation3 + $0x40] sm:$0xff] }
   0xd   :  { %46 = vrot.lane.b32.xlu0 %v497_v0, %s498_s0  ;;  %64 = vrot.lane.b32.xlu1 %v497_v0, %s499_s21  ;;  %s500_s1 = smov 125   ;;  %v55_v7 = vld [vmem:[#allocation6 + $0x10] sm:$0xff]  ;;  %v68_v8 = vld [vmem:[#allocation3 + $0x88] sm:$0xff]  ;;  %v62_v9 = vld [vmem:[#allocation3 + $0x80] sm:$0xff]  ;;  %s501_s22 = smov 123  }
   0xe   :  { %vm71_vm0 = vcmp.eq.s32.totalorder %v55_v7, 1  ;;  %vm73_vm1 = vcmp.ge.s32.totalorder %v55_v7, 0  ;;  %v78_v19 = vld [vmem:[#allocation6 + $0x18] sm:$0xff]  ;;  %v92_v20 = vld [vmem:[#allocation3 + $0xc8] sm:$0xff]  ;;  %v85_v22 = vld [vmem:[#allocation3 + $0xc0] sm:$0xff]  ;;  %s502_s23 = smov 124  }
   0xf   :  { %vm95_vm2 = vcmp.eq.s32.totalorder %v78_v19, 1  ;;  %v101_v26 = vld [vmem:[#allocation3 + $0xd0] sm:$0xff]  ;;  %vm104_vm3 = vcmp.eq.s32.totalorder %v78_v19, 2  ;;  %vm106_vm4 = vcmp.ge.s32.totalorder %v78_v19, 0  ;;  %s503_s24 = smov 122   ;;  %v118_v36 = vld [vmem:[#allocation3 + $0x100] sm:$0xff] }
  0x10   :  { %v126_v40 = vld [vmem:[#allocation3 + $0x108] sm:$0xff]  ;;  %v111_v41 = vld [vmem:[#allocation6 + $0x20] sm:$0xff]  ;;  %v135_v46 = vld [vmem:[#allocation3 + $0x110] sm:$0xff]  ;;  %s504_s25 = smov 121   ;;  %s506_s27 = smov [#allocation8]  }
  0x11   :  { %vm129_vm5 = vcmp.eq.s32.totalorder %v111_v41, 1  ;;  %v144_v48 = vld [vmem:[#allocation3 + $0x118] sm:$0xff]  ;;  %vm138_vm6 = vcmp.eq.s32.totalorder %v111_v41, 2  ;;  %vm147_vm7 = vcmp.eq.s32.totalorder %v111_v41, 3  ;;  %vm149_vm8 = vcmp.ge.s32.totalorder %v111_v41, 0  ;;  %v161_v60 = vld [vmem:[#allocation3 + $0x140] sm:$0xff] }
  0x12   :  { %s384_s28 = sshll.u32 %s506_s27, 4  ;;  %s386_s3 = sshll.u32 %s617_s2, 4  ;;  %s385_s28 = int_to_ptr.vmem [resolvable:$true] %s384_s28  ;;  %s387_s3 = int_to_ptr.hbm [resolvable:$true] %s386_s3 }
  0x7f   :  { %v47_v1 = vpop.permute.xlu0 %46  ;;  %v65_v5 = vpop.permute.xlu1 %64 }
  0x80   :  { %v48_v3 = vadd.f32 1.0, %v47_v1  ;;  %v169_v1 = vld [vmem:[#allocation3 + $0x148] sm:$0xff] }
  0x82   :  { %v532_v4 = vadd.f32 %v50_v2, %v48_v3  ;;  %v154_v3 = vld [vmem:[#allocation6 + $0x28] sm:$0xff] }
  0x83   :  { %vm172_vm9 = vcmp.eq.s32.totalorder %v154_v3, 1  ;;  %vm182_vm10 = vcmp.eq.s32.totalorder %v154_v3, 2  ;;  %vm191_vm11 = vcmp.eq.s32.totalorder %v154_v3, 3  ;;  %vm200_vm12 = vcmp.eq.s32.totalorder %v154_v3, 4 }
  0x84   :  { %88 = vrot.lane.b32.xlu2 %v532_v4, %s499_s21  ;;  %58 = vrot.lane.b32.xlu0 %v532_v4, %s498_s0  ;;  %v66_v6 = vadd.f32 %v65_v5, %v532_v4  ;;  %vm202_vm13 = vcmp.ge.s32.totalorder %v154_v3, 0 }
  0x86   :  { %v69_v12 = vadd.f32 %v68_v8, %v66_v6  ;;  %v179_v8 = vld [vmem:[#allocation3 + $0x150] sm:$0xff] }
  0x8c   :  { %97 = vrot.lane.b32.xlu2 %v497_v0, %s500_s1 }
  0x94   :  { %131 = vrot.lane.b32.xlu2 %v532_v4, %s500_s1 }
  0xde   :  { %v89_v17 = vpop.permute.xlu2 %88 }
  0xdf   :  { %v90_v18 = vadd.f32 %v89_v17, %v532_v4 }
  0xe1   :  { %v93_v27 = vadd.f32 %v92_v20, %v90_v18  ;;  %v197_v18 = vld [vmem:[#allocation3 + $0x160] sm:$0xff] }
  0xe6   :  { %v98_v21 = vpop.permute.xlu2 %97 }
  0xee   :  { %v132_v43 = vpop.permute.xlu2 %131 }
  0xf6   :  { %v59_v10 = vpop.permute.xlu0 %58 }
  0xf7   :  { %v60_v11 = vadd.f32 1.0, %v59_v10 }
  0xf9   :  { %v63_v13 = vadd.f32 %v62_v9, %v60_v11  ;;  %v188_v11 = vld [vmem:[#allocation3 + $0x158] sm:$0xff] }
  0xfb   :  { %v70_v14 = vmax.f32 %v63_v13, %v69_v12  ;;  %v72_v15 = vsel %vm71_vm0, %v69_v12, %v63_v13 }
  0xfd   :  { %v543_v16 = vsel %vm73_vm1, %v72_v15, %v70_v14 }
  0xfe   :  { %81 = vrot.lane.b32.xlu1 %v543_v16, %s498_s0  ;;  %v99_v25 = vadd.f32 %v98_v21, %v543_v16  ;;  %v133_v45 = vadd.f32 %v132_v43, %v543_v16 }
 0x100   :  { %v102_v31 = vadd.f32 %v101_v26, %v99_v25  ;;  %v136_v51 = vadd.f32 %v135_v46, %v133_v45 }
 0x106   :  { %122 = vrot.lane.b32.xlu1 %v543_v16, %s499_s21 }
 0x170   :  { %v82_v23 = vpop.permute.xlu1 %81 }
 0x171   :  { %v83_v24 = vadd.f32 1.0, %v82_v23 }
 0x173   :  { %v86_v28 = vadd.f32 %v85_v22, %v83_v24 }
 0x175   :  { %v94_v29 = vmax.f32 %v86_v28, %v93_v27  ;;  %v96_v30 = vsel %vm95_vm2, %v93_v27, %v86_v28 }
 0x176   :  { %v105_v33 = vsel %vm104_vm3, %v102_v31, %v96_v30 }
 0x177   :  { %v103_v32 = vmax.f32 %v94_v29, %v102_v31  ;;  %v214_v29 = vld [vmem:[#allocation3 + $0x180] sm:$0xff] }
 0x178   :  { %v123_v35 = vpop.permute.xlu1 %122 }
 0x179   :  { %v551_v34 = vsel %vm106_vm4, %v105_v33, %v103_v32  ;;  %v124_v38 = vadd.f32 %v123_v35, %v532_v4  ;;  %v222_v35 = vld [vmem:[#allocation3 + $0x188] sm:$0xff] }
 0x17a   :  { %165 = vrot.lane.b32.xlu2 %v551_v34, %s499_s21  ;;  %114 = vrot.lane.b32.xlu0 %v551_v34, %s498_s0 }
 0x17b   :  { %v127_v44 = vadd.f32 %v126_v40, %v124_v38 }
 0x182   :  { %193 = vrot.lane.b32.xlu2 %v497_v0, %s501_s22  ;;  %140 = vrot.lane.b32.xlu0 %v497_v0, %s502_s23 }
 0x18a   :  { %229 = vrot.lane.b32.xlu2 %v551_v34, %s500_s1  ;;  %175 = vrot.lane.b32.xlu0 %v543_v16, %s500_s1 }
 0x192   :  { %256 = vrot.lane.b32.xlu2 %v497_v0, %s503_s24 }
 0x1d4   :  { %v166_v59 = vpop.permute.xlu2 %165 }
 0x1d5   :  { %v167_v62 = vadd.f32 %v166_v59, %v532_v4 }
 0x1d7   :  { %v170_v6 = vadd.f32 %v169_v1, %v167_v62 }
 0x1dc   :  { %v194_v9 = vpop.permute.xlu2 %193 }
 0x1e4   :  { %v230_v31 = vpop.permute.xlu2 %229 }
 0x1e5   :  { %v231_v38 = vadd.f32 %v230_v31, %v543_v16 }
 0x1ec   :  { %v115_v37 = vpop.permute.xlu0 %114 }
 0x1ed   :  { %v116_v39 = vadd.f32 1.0, %v115_v37 }
 0x1ef   :  { %v119_v42 = vadd.f32 %v118_v36, %v116_v39  ;;  %v207_v36 = vld [vmem:[#allocation6 + $0x30] sm:$0xff] }
 0x1f0   :  { %v233_v39 = vld [vmem:[#allocation3 + $0x190] sm:$0xff]  ;;  %vm225_vm14 = vcmp.eq.s32.totalorder %v207_v36, 1  ;;  %vm236_vm15 = vcmp.eq.s32.totalorder %v207_v36, 2  ;;  %vm245_vm0 = vcmp.eq.s32.totalorder %v207_v36, 3  ;;  %vm254_vm1 = vcmp.eq.s32.totalorder %v207_v36, 4 }
 0x1f1   :  { %v128_v47 = vmax.f32 %v119_v42, %v127_v44  ;;  %v130_v50 = vsel %vm129_vm5, %v127_v44, %v119_v42  ;;  %v234_v43 = vadd.f32 %v233_v39, %v231_v38  ;;  %v242_v44 = vld [vmem:[#allocation3 + $0x198] sm:$0xff]  ;;  %vm263_vm2 = vcmp.eq.s32.totalorder %v207_v36, 5 }
 0x1f2   :  { %v139_v55 = vsel %vm138_vm6, %v136_v51, %v130_v50  ;;  %v251_v50 = vld [vmem:[#allocation3 + $0x1a0] sm:$0xff]  ;;  %vm265_vm3 = vcmp.ge.s32.totalorder %v207_v36, 0 }
 0x1f3   :  { %v137_v53 = vmax.f32 %v128_v47, %v136_v51 }
 0x1f4   :  { %v141_v49 = vpop.permute.xlu0 %140 }
 0x1f5   :  { %v142_v52 = vadd.f32 %v141_v49, %v551_v34  ;;  %v257_v49 = vpop.permute.xlu2 %256 }
 0x1f7   :  { %v145_v54 = vadd.f32 %v144_v48, %v142_v52 }
 0x1f9   :  { %v146_v56 = vmax.f32 %v137_v53, %v145_v54  ;;  %v148_v57 = vsel %vm147_vm7, %v145_v54, %v139_v55  ;;  %v260_v55 = vld [vmem:[#allocation3 + $0x1a8] sm:$0xff] }
 0x1fb   :  { %v570_v58 = vsel %vm149_vm8, %v148_v57, %v146_v56 }
 0x1fc   :  { %292 = vrot.lane.b32.xlu2 %v570_v58, %s500_s1  ;;  %157 = vrot.lane.b32.xlu1 %v570_v58, %s498_s0  ;;  %v176_v2 = vpop.permute.xlu0 %175  ;;  %v195_v13 = vadd.f32 %v194_v9, %v570_v58 }
 0x1fd   :  { %v177_v7 = vadd.f32 %v176_v2, %v543_v16 }
 0x1fe   :  { %v198_v24 = vadd.f32 %v197_v18, %v195_v13 }
 0x1ff   :  { %v180_v14 = vadd.f32 %v179_v8, %v177_v7 }
 0x204   :  { %320 = vrot.lane.b32.xlu2 %v532_v4, %s503_s24  ;;  %184 = vrot.lane.b32.xlu1 %v532_v4, %s502_s23 }
 0x20c   :  { %218 = vrot.lane.b32.xlu1 %v570_v58, %s499_s21 }
 0x214   :  { %247 = vrot.lane.b32.xlu1 %v532_v4, %s501_s22 }
 0x256   :  { %v293_v7 = vpop.permute.xlu2 %292 }
 0x257   :  { %v294_v13 = vadd.f32 %v293_v7, %v543_v16 }
 0x26e   :  { %v158_v61 = vpop.permute.xlu1 %157 }
 0x26f   :  { %v159_v63 = vadd.f32 1.0, %v158_v61 }
 0x271   :  { %v162_v5 = vadd.f32 %v161_v60, %v159_v63 }
 0x273   :  { %v171_v10 = vmax.f32 %v162_v5, %v170_v6  ;;  %v173_v15 = vsel %vm172_vm9, %v170_v6, %v162_v5  ;;  %v277_v5 = vld [vmem:[#allocation3 + $0x1c0] sm:$0xff] }
 0x274   :  { %v183_v21 = vsel %vm182_vm10, %v180_v14, %v173_v15  ;;  %v296_v15 = vld [vmem:[#allocation3 + $0x1d0] sm:$0xff] }
 0x275   :  { %v181_v19 = vmax.f32 %v171_v10, %v180_v14  ;;  %v285_v10 = vld [vmem:[#allocation3 + $0x1c8] sm:$0xff] }
 0x276   :  { %v185_v12 = vpop.permute.xlu1 %184 }
 0x277   :  { %v186_v17 = vadd.f32 %v185_v12, %v551_v34  ;;  %v270_v12 = vld [vmem:[#allocation6 + $0x38] sm:$0xff] }
 0x278   :  { %vm288_vm4 = vcmp.eq.s32.totalorder %v270_v12, 1  ;;  %vm299_vm5 = vcmp.eq.s32.totalorder %v270_v12, 2  ;;  %vm309_vm6 = vcmp.eq.s32.totalorder %v270_v12, 3  ;;  %vm318_vm7 = vcmp.eq.s32.totalorder %v270_v12, 4 }
 0x279   :  { %v189_v20 = vadd.f32 %v188_v11, %v186_v17  ;;  %vm327_vm10 = vcmp.eq.s32.totalorder %v270_v12, 5 }
 0x27b   :  { %v190_v22 = vmax.f32 %v181_v19, %v189_v20  ;;  %v192_v23 = vsel %vm191_vm11, %v189_v20, %v183_v21  ;;  %v344_v19 = vlaneseq  ;;  %v306_v20 = vld [vmem:[#allocation3 + $0x1d8] sm:$0xff]  ;;  %v297_v21 = vadd.f32 %v296_v15, %v294_v13 }
 0x27c   :  { %v201_v26 = vsel %vm200_vm12, %v198_v24, %v192_v23 }
 0x27d   :  { %v199_v25 = vmax.f32 %v190_v22, %v198_v24 }
 0x27e   :  { %v219_v28 = vpop.permute.xlu1 %218 }
 0x27f   :  { %v588_v27 = vsel %vm202_vm13, %v201_v26, %v199_v25  ;;  %v220_v32 = vadd.f32 %v219_v28, %v532_v4  ;;  %v321_v25 = vpop.permute.xlu2 %320  ;;  %v345_v28 = vshrl.u32 %v344_v19, 7  ;;  %vm336_vm13 = vcmp.eq.s32.totalorder %v270_v12, 6 }
 0x280   :  { %281 = vrot.lane.b32.xlu1 %v588_v27, %s499_s21  ;;  %210 = vrot.lane.b32.xlu0 %v588_v27, %s498_s0  ;;  %v258_v51 = vadd.f32 %v257_v49, %v588_v27 }
 0x281   :  { %v223_v40 = vadd.f32 %v222_v35, %v220_v32  ;;  %v347_v35 = vand.u32 127, %v344_v19  ;;  %vm351_vm8 = vcmp.ge.s32.totalorder %v345_v28, 2  ;;  %vm352_vm9 = vcmp.lt.s32.totalorder %v345_v28, 4 }
 0x282   :  { %v261_v62 = vadd.f32 %v260_v55, %v258_v51  ;;  %vm348_vm11 = vcmp.lt.s32.totalorder %v345_v28, 2 }
 0x283   :  { %vm349_vm12 = vcmp.eq.s32.totalorder %v347_v35, 0 }
 0x286   :  { %v248_v41 = vpop.permute.xlu1 %247 }
 0x287   :  { %v249_v46 = vadd.f32 %v248_v41, %v570_v58 }
 0x288   :  { %311 = vrot.lane.b32.xlu1 %v543_v16, %s501_s22  ;;  %238 = vrot.lane.b32.xlu0 %v543_v16, %s502_s23 }
 0x289   :  { %v252_v56 = vadd.f32 %v251_v50, %v249_v46 }
 0x2f2   :  { %v211_v30 = vpop.permute.xlu0 %210  ;;  %v282_v3 = vpop.permute.xlu1 %281 }
 0x2f3   :  { %v212_v33 = vadd.f32 1.0, %v211_v30  ;;  %v283_v8 = vadd.f32 %v282_v3, %v532_v4  ;;  %v315_v4 = vld [vmem:[#allocation3 + $0x1e0] sm:$0xff] }
 0x2f5   :  { %v215_v37 = vadd.f32 %v214_v29, %v212_v33  ;;  %v286_v14 = vadd.f32 %v285_v10, %v283_v8  ;;  %v322_v29 = vadd.f32 %v321_v25, %v588_v27  ;;  %v324_v33 = vld [vmem:[#allocation3 + $0x1e8] sm:$0xff] }
 0x2f7   :  { %v224_v42 = vmax.f32 %v215_v37, %v223_v40  ;;  %v226_v47 = vsel %vm225_vm14, %v223_v40, %v215_v37  ;;  %v333_v37 = vld [vmem:[#allocation3 + $0x1f0] sm:$0xff]  ;;  %vm353_vm14 = vmand %vm351_vm8, %vm352_vm9 }
 0x2f8   :  { %v237_v54 = vsel %vm236_vm15, %v234_v43, %v226_v47  ;;  %vm338_vm15 = vcmp.ge.s32.totalorder %v270_v12, 0 }
 0x2f9   :  { %v235_v52 = vmax.f32 %v224_v42, %v234_v43 }
 0x2fa   :  { %v239_v45 = vpop.permute.xlu0 %238  ;;  %v312_v17 = vpop.permute.xlu1 %311 }
 0x2fb   :  { %v240_v48 = vadd.f32 %v239_v45, %v551_v34  ;;  %v313_v22 = vadd.f32 %v312_v17, %v570_v58 }
 0x2fd   :  { %v243_v53 = vadd.f32 %v242_v44, %v240_v48  ;;  %v316_v30 = vadd.f32 %v315_v4, %v313_v22 }
 0x2ff   :  { %v244_v57 = vmax.f32 %v235_v52, %v243_v53  ;;  %v246_v59 = vsel %vm245_vm0, %v243_v53, %v237_v54  ;;  %vm350_vm0 = vmand %vm348_vm11, %vm349_vm12 }
 0x300   :  { %v255_v61 = vsel %vm254_vm1, %v252_v56, %v246_v59  ;;  %vm354_vm1 = vmand %vm353_vm14, %vm349_vm12 }
 0x301   :  { %v253_v60 = vmax.f32 %v244_v57, %v252_v56  ;;  %v264_v1 = vsel %vm263_vm2, %v261_v62, %v255_v61  ;;  %v505_v56 = vmov 2.0  }
 0x302   :  { %413 = vrcp.f32 %v505_v56 }
 0x303   :  { %v262_v63 = vmax.f32 %v253_v60, %v261_v62 }
 0x305   :  { %v266_v2 = vsel %vm265_vm3, %v264_v1, %v262_v63  ;;  %vm377_vm3 = vcmask 8200  }
 0x306   :  { %273 = vrot.lane.b32.xlu0 %v266_v2, %s498_s0 }
 0x308   :  { %v414_v57 = vpop.eup %413 }
 0x309   :  { %v369_v59 = vmul.f32 2.0, %v414_v57  ;;  %vm373_vm2 = vweird.f32 %v414_v57 }
 0x30b   :  { %v370_v60 = vsub.f32 1.0, %v369_v59 }
 0x30d   :  { %v371_v61 = vmul.f32 %v414_v57, %v370_v60 }
 0x30e   :  { %302 = vrot.lane.b32.xlu0 %v551_v34, %s502_s23 }
 0x30f   :  { %v372_v62 = vadd.f32 %v414_v57, %v371_v61 }
 0x311   :  { %v374_v63 = vsel %vm373_vm2, %v414_v57, %v372_v62 }
 0x316   :  { %329 = vrot.lane.b32.xlu0 %v497_v0, %s504_s25 }
 0x378   :  { %v274_v6 = vpop.permute.xlu0 %273 }
 0x379   :  { %v275_v9 = vadd.f32 1.0, %v274_v6 }
 0x37b   :  { %v278_v11 = vadd.f32 %v277_v5, %v275_v9 }
 0x37d   :  { %v287_v18 = vmax.f32 %v278_v11, %v286_v14  ;;  %v289_v24 = vsel %vm288_vm4, %v286_v14, %v278_v11 }
 0x37e   :  { %v300_v31 = vsel %vm299_vm5, %v297_v21, %v289_v24 }
 0x37f   :  { %v298_v26 = vmax.f32 %v287_v18, %v297_v21 }
 0x380   :  { %v303_v0 = vpop.permute.xlu0 %302 }
 0x381   :  { %v304_v23 = vadd.f32 %v303_v0, %v551_v34  ;;  %v325_v34 = vadd.f32 %v324_v33, %v322_v29 }
 0x383   :  { %v307_v16 = vadd.f32 %v306_v20, %v304_v23 }
 0x385   :  { %v308_v32 = vmax.f32 %v298_v26, %v307_v16  ;;  %v310_v36 = vsel %vm309_vm6, %v307_v16, %v300_v31 }
 0x386   :  { %v319_v39 = vsel %vm318_vm7, %v316_v30, %v310_v36 }
 0x387   :  { %v317_v58 = vmax.f32 %v308_v32, %v316_v30  ;;  %v328_v42 = vsel %vm327_vm10, %v325_v34, %v319_v39 }
 0x388   :  { %v330_v38 = vpop.permute.xlu0 %329 }
 0x389   :  { %v331_v40 = vadd.f32 %v330_v38, %v266_v2  ;;  %v326_v27 = vmax.f32 %v317_v58, %v325_v34 }
 0x38b   :  { %v334_v41 = vadd.f32 %v333_v37, %v331_v40 }
 0x38d   :  { %v335_v43 = vmax.f32 %v326_v27, %v334_v41  ;;  %v337_v44 = vsel %vm336_vm13, %v334_v41, %v328_v42 }
 0x38f   :  { %v339_v45 = vsel %vm338_vm15, %v337_v44, %v335_v43 }
 0x390   :  { %v355_v46 = vsel %vm354_vm1, %v339_v45, 0.0  ;;  %v356_v47 = vsel %vm350_vm0, %v339_v45, 0.0  ;;  %343 = vst [vmem:[#allocation8] sm:$0xff] %v339_v45 }
 0x391   :  { %v357_v48 = vsub.f32 %v355_v46, %v356_v47 }
 0x393   :  { %358 = vadd.xlane.f32.xlu1 %v357_v48 }
 0x406   :  { %v359_v49 = vpop.xlane.xlu1 %358 }
 0x407   :  { %v360_v50 = vrot.slane %v359_v49, 4 }
 0x409   :  { %v361_v51 = vadd.f32 %v360_v50, %v359_v49 }
 0x40b   :  { %v362_v52 = vrot.slane %v361_v51, 2 }
 0x40d   :  { %v363_v53 = vadd.f32 %v362_v52, %v361_v51 }
 0x40f   :  { %v364_v54 = vrot.slane %v363_v53, 1 }
 0x411   :  { %v365_v55 = vadd.f32 %v364_v54, %v363_v53 }
 0x413   :  { %397 = vpush %v365_v55 }
 0x444   :  { %s398_s26 = spop %397 }
 0x445   :  { %v367_v1 = vstv %s398_s26 }
 0x446   :  { %v375_v2 = vmul.f32 %v374_v63, %v367_v1 }
 0x448   :  { %v376_v3 = vadd.f32 1.0, %v375_v2 }
 0x44a   :  { %378 = vst.msk [vmem:[#allocation8] sm:$0x1] %vm377_vm3, %v376_v3 }
 0x44b   :  { %389 = dma.vmem_to_hbm [thread:$0]  %s385_s28, 128, %s387_s3, [#allocation5]  }
 0x44c   :  { %491 = dma.done.wait [#allocation5], 128  }
 0x44d   :  { %492 = vsyncadd [#allocation5], 4294967168 }
 0x44e   :  { %394 = vsyncpa [#allocation4], 1 }
 0x44f   :  { %395 = vsyncpa [#allocation7], 1 }
 0x450   :  { %396 = vsyncpa [#allocation5], 1 }

</bundles_post_ra>
